<compile_context>
chip_gen: v7x
topology: tpu7x:2x2x1
jax: 0.10.0
libtpu: 0.0.40
codegen_flags: <defaults>
</compile_context>

<pallas_src>
import functools
import math

import jax
import jax.numpy as jnp
import numpy as np
from jax.experimental import pallas as pl
from jax.experimental.pallas import tpu as pltpu


def _round_up(x, m):
    return (x + m - 1) // m * m


def _conv_kernel(x_ref, w_ref, b_ref, o_ref, *, Q, Wo, M, Bt):
    """Fused (phase + width-im2col) conv + bias + ReLU for Bt images.

    x_ref : (Bt, Np, Kc)   bf16   Np = (Ho+Q-1)*Wo, Kc = Q*S*S*Cin
    w_ref : (Q, Kc, Cout)  bf16   grid-resident
    b_ref : (1, Cout)      f32    grid-resident
    o_ref : (Bt, M, Cout)  bf16   M = Ho*Wo
    """
    bias = b_ref[...]
    for b in range(Bt):                      # unrolled; Bt <= 8
        # init accumulator with the first tap (no zero-store), then chain
        # back-to-back dots so the accumulation stays in registers / MRB.
        acc = jnp.dot(x_ref[b, 0:M, :], w_ref[0],
                      preferred_element_type=jnp.float32)
        for qh in range(1, Q):
            acc = acc + jnp.dot(x_ref[b, qh * Wo:qh * Wo + M, :], w_ref[qh],
                                preferred_element_type=jnp.float32)
        o_ref[b] = jnp.maximum(acc + bias, 0.0).astype(o_ref.dtype)


def conv2d_bias_relu(x_nhwc, weight, bias, *, stride):
    """Conv2d(stride=stride, padding=0, bias=True) + ReLU.  NHWC in / NHWC bf16 out."""
    B, H, W, Cin = x_nhwc.shape
    Cout, Cin_w, Kh, Kw = weight.shape
    assert Cin_w == Cin and Kh == Kw
    K, S = Kh, stride
    # TODO(synk): phase decomposition assumes K % S == 0 (true for all Nature
    # layers: 8/4, 4/2, 3/1); other geometries would need zero taps.
    assert K % S == 0
    Q = K // S
    Ho = (H - K) // S + 1
    Wo = (W - K) // S + 1
    assert Ho > 0 and Wo > 0

    Hp = Ho + Q - 1            # phase-image rows actually read
    Wp = Wo + Q - 1            # phase-image width needed before the qw fold
    Kc = Q * S * S * Cin       # MXU contraction depth (128 / 256 / 192)
    M = Ho * Wo                # output rows per image (exact, no padding)
    Np = Hp * Wo               # input rows per image after the qw fold

    # ---- host glue: space-to-depth phases + width-only im2col (Qx only) ----
    xs = x_nhwc[:, :S * Hp, :S * Wp, :].astype(jnp.bfloat16)
    x_phase = (xs.reshape(B, Hp, S, Wp, S, Cin)
                 .transpose(0, 1, 3, 2, 4, 5)
                 .reshape(B, Hp, Wp, S * S * Cin))
    # channel order (qw, rh, rw, c): row (i, j) carries all width taps of col j
    x_w = jnp.concatenate([x_phase[:, :, qw:qw + Wo, :] for qw in range(Q)],
                          axis=-1)
    x_flat = x_w.reshape(B, Np, Kc)

    # weights: (Cout, Cin, K, K) -> (Q, Kc, Cout), same (qw, rh, rw, c) order
    w_ph = jnp.transpose(weight, (2, 3, 1, 0))              # (kh, kw, c, co)
    w_ph = (w_ph.reshape(Q, S, Q, S, Cin, Cout)             # (qh, rh, qw, rw, c, co)
                .transpose(0, 2, 1, 3, 4, 5)                # (qh, qw, rh, rw, c, co)
                .reshape(Q, Kc, Cout)
                .astype(jnp.bfloat16))
    b_row = bias.reshape(1, Cout).astype(jnp.float32)

    # ---- batch blocking (amortize per-grid-step overhead) ----
    if B >= 16:
        Bt = 8
    elif B >= 2:
        Bt = B // 2            # keep >= 2 grid steps (megacore / 2-TC chips)
    else:
        Bt = 1
    Bp = _round_up(B, Bt)
    if Bp != B:
        x_flat = jnp.pad(x_flat, ((0, Bp - B), (0, 0), (0, 0)))

    kern = functools.partial(_conv_kernel, Q=Q, Wo=Wo, M=M, Bt=Bt)
    flops = 2 * Bp * M * Kc * Cout * Q
    bytes_accessed = (Bp * Np * Kc * 2 + Q * Kc * Cout * 2 + Cout * 4
                      + Bp * M * Cout * 2)

    out = pl.pallas_call(
        kern,
        out_shape=jax.ShapeDtypeStruct((Bp, M, Cout), jnp.bfloat16),
        grid=(Bp // Bt,),
        in_specs=[
            pl.BlockSpec((Bt, Np, Kc), lambda g: (g, 0, 0)),
            pl.BlockSpec((Q, Kc, Cout), lambda g: (0, 0, 0)),
            pl.BlockSpec((1, Cout), lambda g: (0, 0)),
        ],
        out_specs=pl.BlockSpec((Bt, M, Cout), lambda g: (g, 0, 0)),
        compiler_params=pltpu.CompilerParams(
            dimension_semantics=("parallel",)),
        cost_estimate=pl.CostEstimate(
            flops=flops, transcendentals=0, bytes_accessed=bytes_accessed),
    )(x_flat, w_ph, b_row)

    return out[:B].reshape(B, Ho, Wo, Cout)


def nature_forward(x_nchw, params):
    """Nature.forward with normalize=False (bias=True, bn = Identity)."""
    (w1, b1), (w2, b2), (w3, b3) = params
    # TODO(synk): the normalize=True branch (BatchNorm2d) is not implemented.
    # TODO(synk): fusing all three layers into one pallas_call (intermediates
    # in VMEM) would remove two HBM round trips; kept as three calls because
    # the inter-layer space-to-depth re-layout is done as host glue here.
    x = jnp.transpose(x_nchw, (0, 2, 3, 1))                       # NCHW -> NHWC
    x = conv2d_bias_relu(x, w1, b1, stride=4)
    x = conv2d_bias_relu(x, w2, b2, stride=2)
    x = conv2d_bias_relu(x, w3, b3, stride=1)
    B = x.shape[0]
    # PyTorch xs.view(B, -1) flattens channel-major (NCHW)
    return jnp.transpose(x, (0, 3, 1, 2)).reshape(B, -1).astype(jnp.float32)


# ----------------------------- deterministic params -------------------------
def init_nature_params(key, c_in):
    # Conv2d default init (kaiming_uniform(a=sqrt(5)) -> U(-1/sqrt(fan_in), ..))
    # followed by the module's weight *= relu_gain = sqrt(2).
    relu_gain = math.sqrt(2.0)
    specs = [(c_in, 32, 8), (32, 64, 4), (64, 64, 3)]
    params = []
    for cin, cout, k in specs:
        key, kw_, kb_ = jax.random.split(key, 3)
        fan_in = cin * k * k
        bound = 1.0 / math.sqrt(fan_in)
        w = jax.random.uniform(kw_, (cout, cin, k, k), jnp.float32, -bound, bound)
        w = w * relu_gain
        b = jax.random.uniform(kb_, (cout,), jnp.float32, -bound, bound)
        params.append((w, b))
    return params


def reference_forward(x_nchw, params):
    """XLA reference with the same bf16-input / f32-accumulate numerics."""
    x = x_nchw.astype(jnp.float32)
    for (w, b), s in zip(params, (4, 2, 1)):
        x = jax.lax.conv_general_dilated(
            x.astype(jnp.bfloat16), w.astype(jnp.bfloat16),
            window_strides=(s, s), padding="VALID",
            dimension_numbers=("NCHW", "OIHW", "NCHW"),
            preferred_element_type=jnp.float32)
        x = jnp.maximum(x + b[None, :, None, None], 0.0)
    return x.reshape(x.shape[0], -1)


if __name__ == "__main__":
    key = jax.random.PRNGKey(0)
    k_x, k_p = jax.random.split(key)

    # Atari-style input implied by the module (output dim 3136 = 64*7*7).
    B, C, H, W = 2, 4, 84, 84
    x = jax.random.normal(k_x, (B, C, H, W), jnp.float32)
    params = init_nature_params(k_p, C)

    out = jax.jit(nature_forward)(x, params)
    out = jax.block_until_ready(out)
    assert out.shape == (B, 3136), out.shape

    ref = jax.jit(reference_forward)(x, params)
    ref = jax.block_until_ready(ref)
    np.testing.assert_allclose(np.asarray(out), np.asarray(ref),
                               rtol=2e-2, atol=2e-2)

    print("KERNEL_OK")
</pallas_src>

<mosaic_0001>
module attributes {stable_mosaic.version = 11 : i64} {
  func.func @_conv_kernel(%arg0: i32, %arg1: memref<1x420x128xbf16, #tpu.memory_space<vmem>>, %arg2: memref<2x128x32xbf16, #tpu.memory_space<vmem>>, %arg3: memref<1x32xf32, #tpu.memory_space<vmem>>, %arg4: memref<1x400x32xbf16, #tpu.memory_space<vmem>>) attributes {dimension_semantics = [#tpu.dimension_semantics<parallel>], iteration_bounds = array<i64: 2>, scalar_prefetch = 0 : i64, scratch_operands = 0 : i64, tpu.core_type = #tpu.core_type<tc>, window_params = [{transform_indices = @transform_0, window_bounds = array<i64: 1, 420, 128>}, {pipeline_mode = #tpu.pipeline_mode<synchronous>, transform_indices = @transform_1, window_bounds = array<i64: 2, 128, 32>}, {pipeline_mode = #tpu.pipeline_mode<synchronous>, transform_indices = @transform_2, window_bounds = array<i64: 1, 32>}, {transform_indices = @transform_3, window_bounds = array<i64: 1, 400, 32>}]} {
    %c0 = arith.constant 0 : index
    %c0_0 = arith.constant 0 : index
    %0 = vector.load %arg3[%c0, %c0_0] : memref<1x32xf32, #tpu.memory_space<vmem>>, vector<1x32xf32>
    %c0_1 = arith.constant 0 : index
    %c0_2 = arith.constant 0 : index
    %c0_3 = arith.constant 0 : index
    %1 = vector.load %arg1[%c0_1, %c0_2, %c0_3] : memref<1x420x128xbf16, #tpu.memory_space<vmem>>, vector<1x400x128xbf16>
    %2 = vector.shape_cast %1 : vector<1x400x128xbf16> to vector<400x128xbf16>
    %c0_4 = arith.constant 0 : index
    %c0_5 = arith.constant 0 : index
    %c0_6 = arith.constant 0 : index
    %3 = vector.load %arg2[%c0_4, %c0_5, %c0_6] : memref<2x128x32xbf16, #tpu.memory_space<vmem>>, vector<1x128x32xbf16>
    %4 = vector.shape_cast %3 : vector<1x128x32xbf16> to vector<128x32xbf16>
    %cst = arith.constant dense<0.000000e+00> : vector<400x32xf32>
    %5 = tpu.matmul %2, %4, %cst {dimension_numbers = #tpu.dot_dimension_numbers<[1], [0], [0], [1], [0, 0, 1, 1], [], []>} : vector<400x128xbf16>, vector<128x32xbf16>, vector<400x32xf32> -> vector<400x32xf32>
    %c0_7 = arith.constant 0 : index
    %c20 = arith.constant 20 : index
    %c0_8 = arith.constant 0 : index
    %6 = vector.load %arg1[%c0_7, %c20, %c0_8] : memref<1x420x128xbf16, #tpu.memory_space<vmem>>, vector<1x400x128xbf16>
    %7 = vector.shape_cast %6 : vector<1x400x128xbf16> to vector<400x128xbf16>
    %c1 = arith.constant 1 : index
    %c0_9 = arith.constant 0 : index
    %c0_10 = arith.constant 0 : index
    %8 = vector.load %arg2[%c1, %c0_9, %c0_10] : memref<2x128x32xbf16, #tpu.memory_space<vmem>>, vector<1x128x32xbf16>
    %9 = vector.shape_cast %8 : vector<1x128x32xbf16> to vector<128x32xbf16>
    %cst_11 = arith.constant dense<0.000000e+00> : vector<400x32xf32>
    %10 = tpu.matmul %7, %9, %cst_11 {dimension_numbers = #tpu.dot_dimension_numbers<[1], [0], [0], [1], [0, 0, 1, 1], [], []>} : vector<400x128xbf16>, vector<128x32xbf16>, vector<400x32xf32> -> vector<400x32xf32>
    %11 = arith.addf %5, %10 : vector<400x32xf32>
    %12 = vector.broadcast %0 : vector<1x32xf32> to vector<400x32xf32>
    %13 = arith.addf %11, %12 : vector<400x32xf32>
    %cst_12 = arith.constant 0.000000e+00 : f32
    %14 = vector.broadcast %cst_12 : f32 to vector<400x32xf32>
    %15 = arith.maximumf %13, %14 : vector<400x32xf32>
    %16 = arith.truncf %15 : vector<400x32xf32> to vector<400x32xbf16>
    %c0_13 = arith.constant 0 : index
    %c0_14 = arith.constant 0 : index
    %c0_15 = arith.constant 0 : index
    %17 = vector.load %arg4[%c0_13, %c0_14, %c0_15] : memref<1x400x32xbf16, #tpu.memory_space<vmem>>, vector<1x400x32xbf16>
    %18 = vector.shape_cast %17 : vector<1x400x32xbf16> to vector<400x32xbf16>
    %19 = vector.shape_cast %16 : vector<400x32xbf16> to vector<1x400x32xbf16>
    tpu.vector_store %arg4[%c0_13, %c0_14, %c0_15], %19 {strides = array<i32>} : memref<1x400x32xbf16, #tpu.memory_space<vmem>>, vector<1x400x32xbf16>,
    return
  }
  func.func @transform_0(%arg0: i32) -> (i32, i32, i32) {
    %c0_i32 = arith.constant 0 : i32
    %c0_i32_0 = arith.constant 0 : i32
    %c0_i32_1 = arith.constant 0 : i32
    return %arg0, %c0_i32, %c0_i32_0 : i32, i32, i32
  }
  func.func @transform_1(%arg0: i32) -> (i32, i32, i32) {
    %c0_i32 = arith.constant 0 : i32
    %c0_i32_0 = arith.constant 0 : i32
    %c0_i32_1 = arith.constant 0 : i32
    %c0_i32_2 = arith.constant 0 : i32
    return %c0_i32, %c0_i32_0, %c0_i32_1 : i32, i32, i32
  }
  func.func @transform_2(%arg0: i32) -> (i32, i32) {
    %c0_i32 = arith.constant 0 : i32
    %c0_i32_0 = arith.constant 0 : i32
    %c0_i32_1 = arith.constant 0 : i32
    return %c0_i32, %c0_i32_0 : i32, i32
  }
  func.func @transform_3(%arg0: i32) -> (i32, i32, i32) {
    %c0_i32 = arith.constant 0 : i32
    %c0_i32_0 = arith.constant 0 : i32
    %c0_i32_1 = arith.constant 0 : i32
    return %arg0, %c0_i32, %c0_i32_0 : i32, i32, i32
  }
}

module attributes {stable_mosaic.version = 11 : i64} {
  func.func @_conv_kernel(%arg0: i32, %arg1: memref<1x90x256xbf16, #tpu.memory_space<vmem>>, %arg2: memref<2x256x64xbf16, #tpu.memory_space<vmem>>, %arg3: memref<1x64xf32, #tpu.memory_space<vmem>>, %arg4: memref<1x81x64xbf16, #tpu.memory_space<vmem>>) attributes {dimension_semantics = [#tpu.dimension_semantics<parallel>], iteration_bounds = array<i64: 2>, scalar_prefetch = 0 : i64, scratch_operands = 0 : i64, tpu.core_type = #tpu.core_type<tc>, window_params = [{transform_indices = @transform_0, window_bounds = array<i64: 1, 90, 256>}, {pipeline_mode = #tpu.pipeline_mode<synchronous>, transform_indices = @transform_1, window_bounds = array<i64: 2, 256, 64>}, {pipeline_mode = #tpu.pipeline_mode<synchronous>, transform_indices = @transform_2, window_bounds = array<i64: 1, 64>}, {transform_indices = @transform_3, window_bounds = array<i64: 1, 81, 64>}]} {
    %c0 = arith.constant 0 : index
    %c0_0 = arith.constant 0 : index
    %0 = vector.load %arg3[%c0, %c0_0] : memref<1x64xf32, #tpu.memory_space<vmem>>, vector<1x64xf32>
    %c0_1 = arith.constant 0 : index
    %c0_2 = arith.constant 0 : index
    %c0_3 = arith.constant 0 : index
    %1 = vector.load %arg1[%c0_1, %c0_2, %c0_3] : memref<1x90x256xbf16, #tpu.memory_space<vmem>>, vector<1x81x256xbf16>
    %2 = vector.shape_cast %1 : vector<1x81x256xbf16> to vector<81x256xbf16>
    %c0_4 = arith.constant 0 : index
    %c0_5 = arith.constant 0 : index
    %c0_6 = arith.constant 0 : index
    %3 = vector.load %arg2[%c0_4, %c0_5, %c0_6] : memref<2x256x64xbf16, #tpu.memory_space<vmem>>, vector<1x256x64xbf16>
    %4 = vector.shape_cast %3 : vector<1x256x64xbf16> to vector<256x64xbf16>
    %cst = arith.constant dense<0.000000e+00> : vector<81x64xf32>
    %5 = tpu.matmul %2, %4, %cst {dimension_numbers = #tpu.dot_dimension_numbers<[1], [0], [0], [1], [0, 0, 1, 1], [], []>} : vector<81x256xbf16>, vector<256x64xbf16>, vector<81x64xf32> -> vector<81x64xf32>
    %c0_7 = arith.constant 0 : index
    %c9 = arith.constant 9 : index
    %c0_8 = arith.constant 0 : index
    %6 = vector.load %arg1[%c0_7, %c9, %c0_8] : memref<1x90x256xbf16, #tpu.memory_space<vmem>>, vector<1x81x256xbf16>
    %7 = vector.shape_cast %6 : vector<1x81x256xbf16> to vector<81x256xbf16>
    %c1 = arith.constant 1 : index
    %c0_9 = arith.constant 0 : index
    %c0_10 = arith.constant 0 : index
    %8 = vector.load %arg2[%c1, %c0_9, %c0_10] : memref<2x256x64xbf16, #tpu.memory_space<vmem>>, vector<1x256x64xbf16>
    %9 = vector.shape_cast %8 : vector<1x256x64xbf16> to vector<256x64xbf16>
    %cst_11 = arith.constant dense<0.000000e+00> : vector<81x64xf32>
    %10 = tpu.matmul %7, %9, %cst_11 {dimension_numbers = #tpu.dot_dimension_numbers<[1], [0], [0], [1], [0, 0, 1, 1], [], []>} : vector<81x256xbf16>, vector<256x64xbf16>, vector<81x64xf32> -> vector<81x64xf32>
    %11 = arith.addf %5, %10 : vector<81x64xf32>
    %12 = vector.broadcast %0 : vector<1x64xf32> to vector<81x64xf32>
    %13 = arith.addf %11, %12 : vector<81x64xf32>
    %cst_12 = arith.constant 0.000000e+00 : f32
    %14 = vector.broadcast %cst_12 : f32 to vector<81x64xf32>
    %15 = arith.maximumf %13, %14 : vector<81x64xf32>
    %16 = arith.truncf %15 : vector<81x64xf32> to vector<81x64xbf16>
    %c0_13 = arith.constant 0 : index
    %c0_14 = arith.constant 0 : index
    %c0_15 = arith.constant 0 : index
    %17 = vector.load %arg4[%c0_13, %c0_14, %c0_15] : memref<1x81x64xbf16, #tpu.memory_space<vmem>>, vector<1x81x64xbf16>
    %18 = vector.shape_cast %17 : vector<1x81x64xbf16> to vector<81x64xbf16>
    %19 = vector.shape_cast %16 : vector<81x64xbf16> to vector<1x81x64xbf16>
    tpu.vector_store %arg4[%c0_13, %c0_14, %c0_15], %19 {strides = array<i32>} : memref<1x81x64xbf16, #tpu.memory_space<vmem>>, vector<1x81x64xbf16>,
    return
  }
  func.func @transform_0(%arg0: i32) -> (i32, i32, i32) {
    %c0_i32 = arith.constant 0 : i32
    %c0_i32_0 = arith.constant 0 : i32
    %c0_i32_1 = arith.constant 0 : i32
    return %arg0, %c0_i32, %c0_i32_0 : i32, i32, i32
  }
  func.func @transform_1(%arg0: i32) -> (i32, i32, i32) {
    %c0_i32 = arith.constant 0 : i32
    %c0_i32_0 = arith.constant 0 : i32
    %c0_i32_1 = arith.constant 0 : i32
    %c0_i32_2 = arith.constant 0 : i32
    return %c0_i32, %c0_i32_0, %c0_i32_1 : i32, i32, i32
  }
  func.func @transform_2(%arg0: i32) -> (i32, i32) {
    %c0_i32 = arith.constant 0 : i32
    %c0_i32_0 = arith.constant 0 : i32
    %c0_i32_1 = arith.constant 0 : i32
    return %c0_i32, %c0_i32_0 : i32, i32
  }
  func.func @transform_3(%arg0: i32) -> (i32, i32, i32) {
    %c0_i32 = arith.constant 0 : i32
    %c0_i32_0 = arith.constant 0 : i32
    %c0_i32_1 = arith.constant 0 : i32
    return %arg0, %c0_i32, %c0_i32_0 : i32, i32, i32
  }
}

module attributes {stable_mosaic.version = 11 : i64} {
  func.func @_conv_kernel(%arg0: i32, %arg1: memref<1x63x192xbf16, #tpu.memory_space<vmem>>, %arg2: memref<3x192x64xbf16, #tpu.memory_space<vmem>>, %arg3: memref<1x64xf32, #tpu.memory_space<vmem>>, %arg4: memref<1x49x64xbf16, #tpu.memory_space<vmem>>) attributes {dimension_semantics = [#tpu.dimension_semantics<parallel>], iteration_bounds = array<i64: 2>, scalar_prefetch = 0 : i64, scratch_operands = 0 : i64, tpu.core_type = #tpu.core_type<tc>, window_params = [{transform_indices = @transform_0, window_bounds = array<i64: 1, 63, 192>}, {pipeline_mode = #tpu.pipeline_mode<synchronous>, transform_indices = @transform_1, window_bounds = array<i64: 3, 192, 64>}, {pipeline_mode = #tpu.pipeline_mode<synchronous>, transform_indices = @transform_2, window_bounds = array<i64: 1, 64>}, {transform_indices = @transform_3, window_bounds = array<i64: 1, 49, 64>}]} {
    %c0 = arith.constant 0 : index
    %c0_0 = arith.constant 0 : index
    %0 = vector.load %arg3[%c0, %c0_0] : memref<1x64xf32, #tpu.memory_space<vmem>>, vector<1x64xf32>
    %c0_1 = arith.constant 0 : index
    %c0_2 = arith.constant 0 : index
    %c0_3 = arith.constant 0 : index
    %1 = vector.load %arg1[%c0_1, %c0_2, %c0_3] : memref<1x63x192xbf16, #tpu.memory_space<vmem>>, vector<1x49x192xbf16>
    %2 = vector.shape_cast %1 : vector<1x49x192xbf16> to vector<49x192xbf16>
    %c0_4 = arith.constant 0 : index
    %c0_5 = arith.constant 0 : index
    %c0_6 = arith.constant 0 : index
    %3 = vector.load %arg2[%c0_4, %c0_5, %c0_6] : memref<3x192x64xbf16, #tpu.memory_space<vmem>>, vector<1x192x64xbf16>
    %4 = vector.shape_cast %3 : vector<1x192x64xbf16> to vector<192x64xbf16>
    %cst = arith.constant dense<0.000000e+00> : vector<49x64xf32>
    %5 = tpu.matmul %2, %4, %cst {dimension_numbers = #tpu.dot_dimension_numbers<[1], [0], [0], [1], [0, 0, 1, 1], [], []>} : vector<49x192xbf16>, vector<192x64xbf16>, vector<49x64xf32> -> vector<49x64xf32>
    %c0_7 = arith.constant 0 : index
    %c7 = arith.constant 7 : index
    %c0_8 = arith.constant 0 : index
    %6 = vector.load %arg1[%c0_7, %c7, %c0_8] : memref<1x63x192xbf16, #tpu.memory_space<vmem>>, vector<1x49x192xbf16>
    %7 = vector.shape_cast %6 : vector<1x49x192xbf16> to vector<49x192xbf16>
    %c1 = arith.constant 1 : index
    %c0_9 = arith.constant 0 : index
    %c0_10 = arith.constant 0 : index
    %8 = vector.load %arg2[%c1, %c0_9, %c0_10] : memref<3x192x64xbf16, #tpu.memory_space<vmem>>, vector<1x192x64xbf16>
    %9 = vector.shape_cast %8 : vector<1x192x64xbf16> to vector<192x64xbf16>
    %cst_11 = arith.constant dense<0.000000e+00> : vector<49x64xf32>
    %10 = tpu.matmul %7, %9, %cst_11 {dimension_numbers = #tpu.dot_dimension_numbers<[1], [0], [0], [1], [0, 0, 1, 1], [], []>} : vector<49x192xbf16>, vector<192x64xbf16>, vector<49x64xf32> -> vector<49x64xf32>
    %11 = arith.addf %5, %10 : vector<49x64xf32>
    %c0_12 = arith.constant 0 : index
    %c14 = arith.constant 14 : index
    %c0_13 = arith.constant 0 : index
    %12 = vector.load %arg1[%c0_12, %c14, %c0_13] : memref<1x63x192xbf16, #tpu.memory_space<vmem>>, vector<1x49x192xbf16>
    %13 = vector.shape_cast %12 : vector<1x49x192xbf16> to vector<49x192xbf16>
    %c2 = arith.constant 2 : index
    %c0_14 = arith.constant 0 : index
    %c0_15 = arith.constant 0 : index
    %14 = vector.load %arg2[%c2, %c0_14, %c0_15] : memref<3x192x64xbf16, #tpu.memory_space<vmem>>, vector<1x192x64xbf16>
    %15 = vector.shape_cast %14 : vector<1x192x64xbf16> to vector<192x64xbf16>
    %cst_16 = arith.constant dense<0.000000e+00> : vector<49x64xf32>
    %16 = tpu.matmul %13, %15, %cst_16 {dimension_numbers = #tpu.dot_dimension_numbers<[1], [0], [0], [1], [0, 0, 1, 1], [], []>} : vector<49x192xbf16>, vector<192x64xbf16>, vector<49x64xf32> -> vector<49x64xf32>
    %17 = arith.addf %11, %16 : vector<49x64xf32>
    %18 = vector.broadcast %0 : vector<1x64xf32> to vector<49x64xf32>
    %19 = arith.addf %17, %18 : vector<49x64xf32>
    %cst_17 = arith.constant 0.000000e+00 : f32
    %20 = vector.broadcast %cst_17 : f32 to vector<49x64xf32>
    %21 = arith.maximumf %19, %20 : vector<49x64xf32>
    %22 = arith.truncf %21 : vector<49x64xf32> to vector<49x64xbf16>
    %c0_18 = arith.constant 0 : index
    %c0_19 = arith.constant 0 : index
    %c0_20 = arith.constant 0 : index
    %23 = vector.load %arg4[%c0_18, %c0_19, %c0_20] : memref<1x49x64xbf16, #tpu.memory_space<vmem>>, vector<1x49x64xbf16>
    %24 = vector.shape_cast %23 : vector<1x49x64xbf16> to vector<49x64xbf16>
    %25 = vector.shape_cast %22 : vector<49x64xbf16> to vector<1x49x64xbf16>
    tpu.vector_store %arg4[%c0_18, %c0_19, %c0_20], %25 {strides = array<i32>} : memref<1x49x64xbf16, #tpu.memory_space<vmem>>, vector<1x49x64xbf16>,
    return
  }
  func.func @transform_0(%arg0: i32) -> (i32, i32, i32) {
    %c0_i32 = arith.constant 0 : i32
    %c0_i32_0 = arith.constant 0 : i32
    %c0_i32_1 = arith.constant 0 : i32
    return %arg0, %c0_i32, %c0_i32_0 : i32, i32, i32
  }
  func.func @transform_1(%arg0: i32) -> (i32, i32, i32) {
    %c0_i32 = arith.constant 0 : i32
    %c0_i32_0 = arith.constant 0 : i32
    %c0_i32_1 = arith.constant 0 : i32
    %c0_i32_2 = arith.constant 0 : i32
    return %c0_i32, %c0_i32_0, %c0_i32_1 : i32, i32, i32
  }
  func.func @transform_2(%arg0: i32) -> (i32, i32) {
    %c0_i32 = arith.constant 0 : i32
    %c0_i32_0 = arith.constant 0 : i32
    %c0_i32_1 = arith.constant 0 : i32
    return %c0_i32, %c0_i32_0 : i32, i32
  }
  func.func @transform_3(%arg0: i32) -> (i32, i32, i32) {
    %c0_i32 = arith.constant 0 : i32
    %c0_i32_0 = arith.constant 0 : i32
    %c0_i32_1 = arith.constant 0 : i32
    return %arg0, %c0_i32, %c0_i32_0 : i32, i32, i32
  }
}

</mosaic_0001>

<bundles_post_ra>
// kernel: nature_forward.3
= control target key start
LH: loop header
LB: loop body
LE: loop exit
PB: predicated region body
PF: predicated region fallthrough
CT: control target
= control target key end

     0   :  { %s2026_s12 = smov 0   ;;  %s2424_s0 = inlined_call_operand.vmem [shape: bf16[2,420,128], index: 0, kind: input, shape index: {}]   ;;  %s2425_s1 = inlined_call_operand.vmem [shape: bf16[2,128,32], index: 1, kind: input, shape index: {}]   ;;  %s2426_s2 = inlined_call_operand.vmem [shape: f32[1,32], index: 2, kind: input, shape index: {}]   ;;  %s2427_s3 = inlined_call_operand.vmem [shape: bf16[2,400,32], index: 3, kind: output, shape index: {}]  }
   0x1 LB: > { %s1472_s13 = sadd.s32 4294967295, %s2002_s12   ;;  %p1476_p0 = scmp.ge.s32.totalorder %s2002_s12, 1  ;;  %s2002_s12 = sphi %s2026_s12, %s13_s12  }
   0x2   : > { %p137_p1 = scmp.lt.s32.totalorder %s2002_s12, 3 }
   0x4   : > { %p138_p2 = pnand %p1476_p0, %p137_p1 }
   0x5   : > { %v1952_v0 = vld [vmem:[%s2425_s1 + $0x40] sm:$0xff] (!%p138_p2)   ;;  %v2004_v1 = vmov (!%p138_p2), 0.0   ;;  %v1954_v3 = vld [vmem:[%s2425_s1 + $0x48] sm:$0xff] (!%p138_p2)   ;;  %vm2005_vm0 = vmmov (!%p138_p2), 0   ;;  %p161_p3 = scmp.lt.s32.totalorder (!%p138_p2), %s1472_s13, 1  ;;  %v1956_v5 = vld [vmem:[%s2425_s1 + $0x50] sm:$0xff] (!%p138_p2)  }
   0x6   : > { %141 = sbr.rel (%p138_p2) target bundleno = 454 (0x1c6), region = 32  ;;  %1708 = vmatprep.subr.bf16.mxu0 (!%p138_p2), %v2004_v1  ;;  %1824 = vmatprep.subr.bf16.mxu1 (!%p138_p2), %v2004_v1  ;;  %v1953_v2 = vld [vmem:[%s2425_s1] sm:$0xff] (!%p138_p2)   ;;  %v1955_v4 = vld [vmem:[%s2425_s1 + $0x8] sm:$0xff] (!%p138_p2)   ;;  %v1957_v6 = vld [vmem:[%s2425_s1 + $0x10] sm:$0xff] (!%p138_p2)   ;;  %vm388_vm1 = vcmask (!%p138_p2), 1045504   ;;  %vm1366_vm2 = vcmask (!%p138_p2), 257024  }
   0x7   : > { %1709 = vmatpush3.bf16.msra.mxu0 (!%p138_p2), %v1952_v0  ;;  %1724 = vmatprep.mubr.msk.bf16.mxu0 (!%p138_p2), %vm2005_vm0, %v2004_v1  ;;  %v1958_v7 = vld [vmem:[%s2425_s1 + $0x58] sm:$0xff] (!%p138_p2)   ;;  %v1960_v9 = vld [vmem:[%s2425_s1 + $0x60] sm:$0xff] (!%p138_p2)   ;;  %v1962_v11 = vld [vmem:[%s2425_s1 + $0x68] sm:$0xff] (!%p138_p2)  }
   0x8   : > { %1825 = vmatpush3.bf16.msra.mxu1 (!%p138_p2), %v1953_v2  ;;  %1710 = vmatprep.subr.bf16.mxu0 (!%p138_p2), %v2004_v1  ;;  %v1959_v8 = vld [vmem:[%s2425_s1 + $0x18] sm:$0xff] (!%p138_p2)   ;;  %v1961_v10 = vld [vmem:[%s2425_s1 + $0x20] sm:$0xff] (!%p138_p2)   ;;  %v1963_v12 = vld [vmem:[%s2425_s1 + $0x28] sm:$0xff] (!%p138_p2)  }
   0x9   : > { %1826 = vmatprep.subr.bf16.mxu1 (!%p138_p2), %v2004_v1  ;;  %1840 = vmatprep.mubr.msk.bf16.mxu1 (!%p138_p2), %vm2005_vm0, %v2004_v1  ;;  %v1964_v15 = vld [vmem:[%s2425_s1 + $0x70] sm:$0xff] (!%p138_p2)   ;;  %v1966_v19 = vld [vmem:[%s2425_s1 + $0x78] sm:$0xff] (!%p138_p2)  }
   0xa   : > { %v1965_v18 = vld [vmem:[%s2425_s1 + $0x30] sm:$0xff] (!%p138_p2)   ;;  %v1967_v22 = vld [vmem:[%s2425_s1 + $0x38] sm:$0xff] (!%p138_p2)  }
   0xb   : > { %1711 = vmatpush3.bf16.msra.mxu0 (!%p138_p2), %v1954_v3 }
   0xc   : > { %1827 = vmatpush3.bf16.msra.mxu1 (!%p138_p2), %v1955_v4  ;;  %1712 = vmatprep.subr.bf16.mxu0 (!%p138_p2), %v2004_v1 }
   0xd   : > { %s2429_s13 = smov (!%p161_p3, %s1472_s13), 1  ;;  %1828 = vmatprep.subr.bf16.mxu1 %v2004_v1 }
   0xe   : > { %s1940_s30 = smul.u32 212, %s2429_s13 }
   0xf   : > { %1713 = vmatpush3.bf16.msra.mxu0 %v1956_v5  ;;  %s1941_s27 = smul.u32 200, %s2429_s13 }
  0x10   : > { %1829 = vmatpush3.bf16.msra.mxu1 %v1957_v6  ;;  %1714 = vmatprep.subr.bf16.mxu0 %v2004_v1  ;;  %s2083_s10 = scalar_lea.vmem %s2424_s0, %s1940_s30 }
  0x11   : > { %1830 = vmatprep.subr.bf16.mxu1 %v2004_v1  ;;  %v176_v13 = vld [vmem:[%s2083_s10 + $0xc] sm:$0xf]  ;;  %v239_v14 = vld [vmem:[%s2083_s10 + $0x8] sm:$0xc]  ;;  %v1969_v17 = vld [vmem:[%s2083_s10 + $0x10] sm:$0xff]   ;;  %s2271_s30 = scalar_lea.vmem %s2427_s3, %s1941_s27 }
  0x12   : > { %v1495_v16 = vcombine.low %v239_v14, %v176_v13  ;;  %v390_v21 = vrot.slane %v1969_v17, 2  ;;  %v1970_v23 = vld [vmem:[%s2083_s10] sm:$0xff]   ;;  %v1971_v25 = vld [vmem:[%s2083_s10 + $0x18] sm:$0xff]   ;;  %v175_v27 = vld [vmem:[%s2083_s10 + $0x8] sm:$0xf] }
  0x13   : > { %1715 = vmatpush3.bf16.msra.mxu0 %v1958_v7  ;;  %v392_v26 = vrot.slane %v1971_v25, 2  ;;  %v1973_v28 = vld [vmem:[%s2083_s10 + $0x20] sm:$0xff]   ;;  %v1530_v30 = vcombine.low %v175_v27, %v176_v13  ;;  %v1974_v33 = vld [vmem:[%s2083_s10 + $0x28] sm:$0xff]   ;;  %v1975_v36 = vld [vmem:[%s2083_s10 + $0x30] sm:$0xff]  }
  0x14   : > { %1831 = vmatpush3.bf16.msra.mxu1 %v1959_v8  ;;  %1716 = vmatprep.subr.bf16.mxu0 %v2004_v1  ;;  %v389_v20 = vrot.slane %v1495_v16, 2  ;;  %v394_v31 = vrot.slane %v1973_v28, 2  ;;  %v396_v34 = vrot.slane %v1974_v33, 2  ;;  %v398_v37 = vrot.slane %v1975_v36, 2  ;;  %v1976_v39 = vld [vmem:[%s2083_s10 + $0x38] sm:$0xff]   ;;  %v1977_v42 = vld [vmem:[%s2083_s10 + $0x40] sm:$0xff]  }
  0x15   : > { %1832 = vmatprep.subr.bf16.mxu1 %v2004_v1  ;;  %v393_v29 = vsel %vm388_vm1, %v390_v21, %v392_v26  ;;  %v400_v40 = vrot.slane %v1976_v39, 2  ;;  %v402_v43 = vrot.slane %v1977_v42, 2  ;;  %v1978_v45 = vld [vmem:[%s2083_s10 + $0x48] sm:$0xff]   ;;  %v1979_v48 = vld [vmem:[%s2083_s10 + $0x50] sm:$0xff]   ;;  %v1980_v51 = vld [vmem:[%s2083_s10 + $0x58] sm:$0xff]  }
  0x16   : > { %v391_v24 = vsel %vm388_vm1, %v389_v20, %v390_v21  ;;  %v395_v32 = vsel %vm388_vm1, %v392_v26, %v394_v31  ;;  %v397_v35 = vsel %vm388_vm1, %v394_v31, %v396_v34  ;;  %v399_v38 = vsel %vm388_vm1, %v396_v34, %v398_v37  ;;  %v1981_v54 = vld [vmem:[%s2083_s10 + $0x60] sm:$0xff]   ;;  %v1982_v57 = vld [vmem:[%s2083_s10 + $0x68] sm:$0xff]   ;;  %v1983_v60 = vld [vmem:[%s2083_s10 + $0x70] sm:$0xff]  }
  0x17   : > { %1717 = vmatpush3.bf16.msra.mxu0 %v1960_v9  ;;  %v401_v41 = vsel %vm388_vm1, %v398_v37, %v400_v40  ;;  %v403_v44 = vsel %vm388_vm1, %v400_v40, %v402_v43  ;;  %v404_v46 = vrot.slane %v1978_v45, 2  ;;  %v406_v49 = vrot.slane %v1979_v48, 2  ;;  %v1984_v63 = vld [vmem:[%s2083_s10 + $0x78] sm:$0xff]   ;;  %v1985_v3 = vld [vmem:[%s2083_s10 + $0x80] sm:$0xff]   ;;  %v1986_v6 = vld [vmem:[%s2083_s10 + $0x88] sm:$0xff]  }
  0x18   : > { %1833 = vmatpush3.bf16.msra.mxu1 %v1961_v10  ;;  %1718 = vmatprep.subr.bf16.mxu0 %v2004_v1  ;;  %v408_v52 = vrot.slane %v1980_v51, 2  ;;  %v410_v55 = vrot.slane %v1981_v54, 2  ;;  %v412_v58 = vrot.slane %v1982_v57, 2  ;;  %v414_v61 = vrot.slane %v1983_v60, 2  ;;  %v1987_v9 = vld [vmem:[%s2083_s10 + $0x90] sm:$0xff]   ;;  %v1993_v27 = vld [vmem:[%s2083_s10 + $0xc0] sm:$0xff]  }
  0x19   : > { %1834 = vmatprep.subr.bf16.mxu1 %v2004_v1  ;;  %v405_v47 = vsel %vm388_vm1, %v402_v43, %v404_v46  ;;  %v407_v50 = vsel %vm388_vm1, %v404_v46, %v406_v49  ;;  %v416_v0 = vrot.slane %v1984_v63, 2  ;;  %v418_v4 = vrot.slane %v1985_v3, 2  ;;  %v1991_v21 = vld [vmem:[%s2083_s10 + $0xb0] sm:$0xff]   ;;  %v2263_v37 = vld [vmem:[%s2426_s2] ss:$0 sm:$0xff] }
  0x1a   : > { %v409_v53 = vsel %vm388_vm1, %v406_v49, %v408_v52  ;;  %v411_v56 = vsel %vm388_vm1, %v408_v52, %v410_v55  ;;  %v413_v59 = vsel %vm388_vm1, %v410_v55, %v412_v58  ;;  %v415_v62 = vsel %vm388_vm1, %v412_v58, %v414_v61 }
  0x1b   : > { %1719 = vmatpush3.bf16.msra.mxu0 %v1962_v11  ;;  %v417_v2 = vsel %vm388_vm1, %v414_v61, %v416_v0  ;;  %v419_v5 = vsel %vm388_vm1, %v416_v0, %v418_v4  ;;  %v420_v7 = vrot.slane %v1986_v6, 2  ;;  %v422_v10 = vrot.slane %v1987_v9, 2 }
  0x1c   : > { %1835 = vmatpush3.bf16.msra.mxu1 %v1963_v12  ;;  %1720 = vmatprep.subr.bf16.mxu0 %v2004_v1  ;;  %v1988_v12 = vld [vmem:[%s2083_s10 + $0x98] sm:$0xff]  }
  0x1d   : > { %1836 = vmatprep.subr.bf16.mxu1 %v2004_v1  ;;  %v421_v8 = vsel %vm388_vm1, %v418_v4, %v420_v7  ;;  %v423_v11 = vsel %vm388_vm1, %v420_v7, %v422_v10  ;;  %v424_v13 = vrot.slane %v1988_v12, 2 }
  0x1f   : > { %1721 = vmatpush3.bf16.msra.mxu0 %v1964_v15  ;;  %v425_v14 = vsel %vm388_vm1, %v422_v10, %v424_v13  ;;  %v1989_v15 = vld [vmem:[%s2083_s10 + $0xa0] sm:$0xff]  }
  0x20   : > { %1837 = vmatpush3.bf16.msra.mxu1 %v1965_v18  ;;  %1722 = vmatprep.subr.bf16.mxu0 %v2004_v1  ;;  %v426_v16 = vrot.slane %v1989_v15, 2  ;;  %v1990_v18 = vld [vmem:[%s2083_s10 + $0xa8] sm:$0xff]  }
  0x21   : > { %1838 = vmatprep.subr.bf16.mxu1 %v2004_v1 }
  0x23   : > { %1723 = vmatpush3.bf16.msra.mxu0 %v1966_v19  ;;  %v428_v19 = vrot.slane %v1990_v18, 2 }
  0x24   : > { %1839 = vmatpush3.bf16.msra.mxu1 %v1967_v22  ;;  %v430_v22 = vrot.slane %v1991_v21, 2 }
  0x25   : > { %v429_v20 = vsel %vm388_vm1, %v426_v16, %v428_v19 }
  0x26   : > { %1725 = vmatmul.mubr.bf16.vlgmr.msra.gmra.mrb[0].mxu0 %v391_v24  ;;  %v1992_v24 = vld [vmem:[%s2083_s10 + $0xb8] sm:$0xff]  }
  0x27   : > { %1841 = vmatmul.mubr.bf16.vlgmr.msra.gmra.mrb[0].mxu1 %v1970_v23  ;;  %1728 = vmatprep.mubr.msk.bf16.mxu0 %vm2005_vm0, %v2004_v1  ;;  %v431_v23 = vsel %vm388_vm1, %v428_v19, %v430_v22 }
  0x28   : > { %1844 = vmatprep.mubr.msk.bf16.mxu1 %vm2005_vm0, %v2004_v1 }
  0x2e   : > { %1729 = vmatmul.mubr.bf16.gmra.mrb[4].mxu0 %v393_v29 }
  0x2f   : > { %1845 = vmatmul.mubr.bf16.gmra.mrb[4].mxu1 %v1530_v30  ;;  %1732 = vmatprep.mubr.msk.bf16.mxu0 %vm2005_vm0, %v2004_v1  ;;  %v1994_v30 = vld [vmem:[%s2083_s10 + $0xc8] sm:$0xff]  }
  0x30   : > { %1848 = vmatprep.mubr.msk.bf16.mxu1 %vm2005_vm0, %v2004_v1  ;;  %v436_v31 = vrot.slane %v1994_v30, 2 }
  0x36   : > { %1733 = vmatmul.mubr.bf16.gmra.mrb[8].mxu0 %v395_v32 }
  0x37   : > { %1849 = vmatmul.mubr.bf16.gmra.mrb[8].mxu1 %v1969_v17  ;;  %1736 = vmatprep.mubr.msk.bf16.mxu0 %vm2005_vm0, %v2004_v1  ;;  %v427_v17 = vsel %vm388_vm1, %v424_v13, %v426_v16 }
  0x38   : > { %1852 = vmatprep.mubr.msk.bf16.mxu1 %vm2005_vm0, %v2004_v1 }
  0x3e   : > { %1737 = vmatmul.mubr.bf16.gmra.mrb[12].mxu0 %v397_v35 }
  0x3f   : > { %1853 = vmatmul.mubr.bf16.gmra.mrb[12].mxu1 %v1971_v25  ;;  %1740 = vmatprep.mubr.msk.bf16.mxu0 %vm2005_vm0, %v2004_v1  ;;  %v432_v25 = vrot.slane %v1992_v24, 2 }
  0x40   : > { %1856 = vmatprep.mubr.msk.bf16.mxu1 %vm2005_vm0, %v2004_v1 }
  0x41   : > { %v433_v26 = vsel %vm388_vm1, %v430_v22, %v432_v25 }
  0x46   : > { %1741 = vmatmul.mubr.bf16.gmra.mrb[16].mxu0 %v399_v38 }
  0x47   : > { %1857 = vmatmul.mubr.bf16.gmra.mrb[16].mxu1 %v1973_v28  ;;  %1744 = vmatprep.mubr.msk.bf16.mxu0 %vm2005_vm0, %v2004_v1  ;;  %v434_v28 = vrot.slane %v1993_v27, 2 }
  0x48   : > { %1860 = vmatprep.mubr.msk.bf16.mxu1 %vm2005_vm0, %v2004_v1 }
  0x49   : > { %v435_v29 = vsel %vm388_vm1, %v432_v25, %v434_v28  ;;  %v437_v32 = vsel %vm388_vm1, %v434_v28, %v436_v31 }
  0x4e   : > { %1745 = vmatmul.mubr.bf16.gmra.mrb[20].mxu0 %v401_v41 }
  0x4f   : > { %1861 = vmatmul.mubr.bf16.gmra.mrb[20].mxu1 %v1974_v33  ;;  %1748 = vmatprep.mubr.msk.bf16.mxu0 %vm2005_vm0, %v2004_v1  ;;  %v1995_v33 = vld [vmem:[%s2083_s10 + $0xd0] ss:$0 sps:$4 sm:$0x33]  }
  0x50   : > { %1864 = vmatprep.mubr.msk.bf16.mxu1 %vm2005_vm0, %v2004_v1  ;;  %v438_v34 = vrot.slane %v1995_v33, 2 }
  0x52   : > { %v439_v35 = vsel %vm388_vm1, %v436_v31, %v438_v34 }
  0x56   : > { %1749 = vmatmul.mubr.bf16.gmra.mrb[24].mxu0 %v403_v44 }
  0x57   : > { %1865 = vmatmul.mubr.bf16.gmra.mrb[24].mxu1 %v1975_v36  ;;  %1752 = vmatprep.mubr.msk.bf16.mxu0 %vm2005_vm0, %v2004_v1 }
  0x58   : > { %1868 = vmatprep.mubr.msk.bf16.mxu1 %vm2005_vm0, %v2004_v1 }
  0x5e   : > { %1753 = vmatmul.mubr.bf16.gmra.mrb[28].mxu0 %v405_v47 }
  0x5f   : > { %1869 = vmatmul.mubr.bf16.gmra.mrb[28].mxu1 %v1976_v39  ;;  %1756 = vmatprep.mubr.msk.bf16.mxu0 %vm2005_vm0, %v2004_v1 }
  0x60   : > { %1872 = vmatprep.mubr.msk.bf16.mxu1 %vm2005_vm0, %v2004_v1 }
  0x66   : > { %1757 = vmatmul.mubr.bf16.gmra.mrb[32].mxu0 %v407_v50 }
  0x67   : > { %1873 = vmatmul.mubr.bf16.gmra.mrb[32].mxu1 %v1977_v42  ;;  %1760 = vmatprep.mubr.msk.bf16.mxu0 %vm2005_vm0, %v2004_v1 }
  0x68   : > { %1876 = vmatprep.mubr.msk.bf16.mxu1 %vm2005_vm0, %v2004_v1 }
  0x6e   : > { %1761 = vmatmul.mubr.bf16.gmra.mrb[36].mxu0 %v409_v53 }
  0x6f   : > { %1877 = vmatmul.mubr.bf16.gmra.mrb[36].mxu1 %v1978_v45  ;;  %1764 = vmatprep.mubr.msk.bf16.mxu0 %vm2005_vm0, %v2004_v1 }
  0x70   : > { %1880 = vmatprep.mubr.msk.bf16.mxu1 %vm2005_vm0, %v2004_v1 }
  0x76   : > { %1765 = vmatmul.mubr.bf16.gmra.mrb[40].mxu0 %v411_v56 }
  0x77   : > { %1881 = vmatmul.mubr.bf16.gmra.mrb[40].mxu1 %v1979_v48  ;;  %1768 = vmatprep.mubr.msk.bf16.mxu0 %vm2005_vm0, %v2004_v1 }
  0x78   : > { %1884 = vmatprep.mubr.msk.bf16.mxu1 %vm2005_vm0, %v2004_v1 }
  0x7e   : > { %1769 = vmatmul.mubr.bf16.gmra.mrb[44].mxu0 %v413_v59 }
  0x7f   : > { %1885 = vmatmul.mubr.bf16.gmra.mrb[44].mxu1 %v1980_v51  ;;  %1772 = vmatprep.mubr.msk.bf16.mxu0 %vm2005_vm0, %v2004_v1 }
  0x80   : > { %1888 = vmatprep.mubr.msk.bf16.mxu1 %vm2005_vm0, %v2004_v1 }
  0x86   : > { %1773 = vmatmul.mubr.bf16.gmra.mrb[48].mxu0 %v415_v62 }
  0x87   : > { %1889 = vmatmul.mubr.bf16.gmra.mrb[48].mxu1 %v1981_v54  ;;  %1776 = vmatprep.mubr.msk.bf16.mxu0 %vm2005_vm0, %v2004_v1 }
  0x88   : > { %1892 = vmatprep.mubr.msk.bf16.mxu1 %vm2005_vm0, %v2004_v1 }
  0x8e   : > { %1777 = vmatmul.mubr.bf16.gmra.mrb[52].mxu0 %v417_v2 }
  0x8f   : > { %1893 = vmatmul.mubr.bf16.gmra.mrb[52].mxu1 %v1982_v57  ;;  %1780 = vmatprep.mubr.msk.bf16.mxu0 %vm2005_vm0, %v2004_v1 }
  0x90   : > { %1896 = vmatprep.mubr.msk.bf16.mxu1 %vm2005_vm0, %v2004_v1 }
  0x96   : > { %1781 = vmatmul.mubr.bf16.gmra.mrb[56].mxu0 %v419_v5 }
  0x97   : > { %1897 = vmatmul.mubr.bf16.gmra.mrb[56].mxu1 %v1983_v60  ;;  %1784 = vmatprep.mubr.msk.bf16.mxu0 %vm2005_vm0, %v2004_v1 }
  0x98   : > { %1900 = vmatprep.mubr.msk.bf16.mxu1 %vm2005_vm0, %v2004_v1 }
  0x9e   : > { %1785 = vmatmul.mubr.bf16.gmra.mrb[60].mxu0 %v421_v8 }
  0x9f   : > { %1901 = vmatmul.mubr.bf16.gmra.mrb[60].mxu1 %v1984_v63  ;;  %1788 = vmatprep.mubr.msk.bf16.mxu0 %vm2005_vm0, %v2004_v1 }
  0xa0   : > { %1904 = vmatprep.mubr.msk.bf16.mxu1 %vm2005_vm0, %v2004_v1 }
  0xa6   : > { %1789 = vmatmul.mubr.bf16.gmra.mrb[64].mxu0 %v423_v11 }
  0xa7   : > { %1905 = vmatmul.mubr.bf16.gmra.mrb[64].mxu1 %v1985_v3  ;;  %1792 = vmatprep.mubr.msk.bf16.mxu0 %vm2005_vm0, %v2004_v1 }
  0xa8   : > { %1908 = vmatprep.mubr.msk.bf16.mxu1 %vm2005_vm0, %v2004_v1 }
  0xae   : > { %1793 = vmatmul.mubr.bf16.gmra.mrb[68].mxu0 %v425_v14 }
  0xaf   : > { %1909 = vmatmul.mubr.bf16.gmra.mrb[68].mxu1 %v1986_v6  ;;  %1796 = vmatprep.mubr.msk.bf16.mxu0 %vm2005_vm0, %v2004_v1 }
  0xb0   : > { %1912 = vmatprep.mubr.msk.bf16.mxu1 %vm2005_vm0, %v2004_v1 }
  0xb6   : > { %1797 = vmatmul.mubr.bf16.gmra.mrb[72].mxu0 %v427_v17 }
  0xb7   : > { %1913 = vmatmul.mubr.bf16.gmra.mrb[72].mxu1 %v1987_v9  ;;  %1800 = vmatprep.mubr.msk.bf16.mxu0 %vm2005_vm0, %v2004_v1 }
  0xb8   : > { %1916 = vmatprep.mubr.msk.bf16.mxu1 %vm2005_vm0, %v2004_v1 }
  0xbe   : > { %1801 = vmatmul.mubr.bf16.gmra.mrb[76].mxu0 %v429_v20 }
  0xbf   : > { %1917 = vmatmul.mubr.bf16.gmra.mrb[76].mxu1 %v1988_v12  ;;  %1804 = vmatprep.mubr.msk.bf16.mxu0 %vm2005_vm0, %v2004_v1 }
  0xc0   : > { %1920 = vmatprep.mubr.msk.bf16.mxu1 %vm2005_vm0, %v2004_v1 }
  0xc6   : > { %1805 = vmatmul.mubr.bf16.gmra.mrb[80].mxu0 %v431_v23 }
  0xc7   : > { %1921 = vmatmul.mubr.bf16.gmra.mrb[80].mxu1 %v1989_v15  ;;  %1808 = vmatprep.mubr.msk.bf16.mxu0 %vm2005_vm0, %v2004_v1 }
  0xc8   : > { %1924 = vmatprep.mubr.msk.bf16.mxu1 %vm2005_vm0, %v2004_v1 }
  0xce   : > { %1809 = vmatmul.mubr.bf16.gmra.mrb[84].mxu0 %v433_v26 }
  0xcf   : > { %1925 = vmatmul.mubr.bf16.gmra.mrb[84].mxu1 %v1990_v18  ;;  %1812 = vmatprep.mubr.msk.bf16.mxu0 %vm2005_vm0, %v2004_v1 }
  0xd0   : > { %1928 = vmatprep.mubr.msk.bf16.mxu1 %vm2005_vm0, %v2004_v1 }
  0xd6   : > { %1813 = vmatmul.mubr.bf16.gmra.mrb[88].mxu0 %v435_v29 }
  0xd7   : > { %1929 = vmatmul.mubr.bf16.gmra.mrb[88].mxu1 %v1991_v21  ;;  %1816 = vmatprep.mubr.msk.bf16.mxu0 %vm2005_vm0, %v2004_v1 }
  0xd8   : > { %1932 = vmatprep.mubr.msk.bf16.mxu1 %vm2005_vm0, %v2004_v1 }
  0xde   : > { %1817 = vmatmul.mubr.bf16.gmra.mrb[92].mxu0 %v437_v32 }
  0xdf   : > { %1933 = vmatmul.mubr.bf16.gmra.mrb[92].mxu1 %v1992_v24  ;;  %1820 = vmatprep.mubr.msk.bf16.mxu0 %vm2005_vm0, %v2004_v1 }
  0xe0   : > { %1936 = vmatprep.mubr.msk.bf16.mxu1 %vm2005_vm0, %v2004_v1 }
  0xe6   : > { %1821 = vmatmul.mubr.bf16.gmra.mrb[96].mxu0 %v439_v35 }
  0xe7   : > { %1937 = vmatmul.mubr.bf16.gmra.mrb[96].mxu1 %v1993_v27 }
  0xf9   : > { %v547_v36 = vpop.f32.mrb[0].mxu0 }
  0xfa   : > { %v861_v38 = vpop.f32.mrb[0].mxu1  ;;  %v1726_v39 = vpop.f32.mrb[1].mxu0 }
  0xfb   : > { %v862_v40 = vadd.f32 %v861_v38, %v547_v36  ;;  %v1842_v41 = vpop.f32.mrb[1].mxu1  ;;  %v550_v42 = vpop.f32.mrb[2].mxu0 }
  0xfc   : > { %v864_v43 = vpop.f32.mrb[2].mxu1  ;;  %v1727_v44 = vpop.f32.mrb[3].mxu0 }
  0xfd   : > { %v1066_v1 = vadd.f32 %v2263_v37, %v862_v40  ;;  %v865_v45 = vadd.f32 %v864_v43, %v550_v42  ;;  %v1843_v46 = vpop.f32.mrb[3].mxu1 }
  0xff   : > { %v1116_v47 = vmax.f32 %v1066_v1, 0.0  ;;  %v1067_v48 = vadd.f32 %v2263_v37, %v865_v45 }
 0x101   : > { %v1592_v49 = vpack.c.bf16 %v1116_v47, %v1116_v47  ;;  %v1117_v50 = vmax.f32 %v1067_v48, 0.0  ;;  %v555_v51 = vpop.f32.mrb[4].mxu0 }
 0x102   : > { %v869_v52 = vpop.f32.mrb[4].mxu1  ;;  %v1730_v53 = vpop.f32.mrb[5].mxu0 }
 0x103   : > { %1367 = vst.msk [vmem:[%s2271_s30] sm:$0xf] %vm1366_vm2, %v1592_v49  ;;  %v1593_v54 = vpack.c.bf16 %v1117_v50, %v1117_v50  ;;  %v870_v55 = vadd.f32 %v869_v52, %v555_v51  ;;  %v1846_v56 = vpop.f32.mrb[5].mxu1  ;;  %v558_v57 = vpop.f32.mrb[6].mxu0 }
 0x104   : > { %v872_v58 = vpop.f32.mrb[6].mxu1  ;;  %v1731_v59 = vpop.f32.mrb[7].mxu0 }
 0x105   : > { %1368 = vst.msk [vmem:[%s2271_s30 + $0x4] sm:$0xf] %vm1366_vm2, %v1593_v54  ;;  %v1068_v60 = vadd.f32 %v2263_v37, %v870_v55  ;;  %v873_v61 = vadd.f32 %v872_v58, %v558_v57  ;;  %v1847_v62 = vpop.f32.mrb[7].mxu1 }
 0x107   : > { %v1118_v63 = vmax.f32 %v1068_v60, 0.0  ;;  %v1069_v0 = vadd.f32 %v2263_v37, %v873_v61 }
 0x109   : > { %v1594_v2 = vpack.c.bf16 %v1118_v63, %v1118_v63  ;;  %v1119_v3 = vmax.f32 %v1069_v0, 0.0  ;;  %v563_v4 = vpop.f32.mrb[8].mxu0 }
 0x10a   : > { %v877_v5 = vpop.f32.mrb[8].mxu1  ;;  %v1734_v6 = vpop.f32.mrb[9].mxu0 }
 0x10b   : > { %1369 = vst.msk [vmem:[%s2271_s30 + $0x8] sm:$0xf] %vm1366_vm2, %v1594_v2  ;;  %v1595_v7 = vpack.c.bf16 %v1119_v3, %v1119_v3  ;;  %v878_v8 = vadd.f32 %v877_v5, %v563_v4  ;;  %v1850_v9 = vpop.f32.mrb[9].mxu1  ;;  %v566_v10 = vpop.f32.mrb[10].mxu0 }
 0x10c   : > { %v880_v11 = vpop.f32.mrb[10].mxu1  ;;  %v1735_v12 = vpop.f32.mrb[11].mxu0 }
 0x10d   : > { %1370 = vst.msk [vmem:[%s2271_s30 + $0xc] sm:$0xf] %vm1366_vm2, %v1595_v7  ;;  %v1070_v13 = vadd.f32 %v2263_v37, %v878_v8  ;;  %v881_v14 = vadd.f32 %v880_v11, %v566_v10  ;;  %v1851_v15 = vpop.f32.mrb[11].mxu1 }
 0x10f   : > { %v1120_v16 = vmax.f32 %v1070_v13, 0.0  ;;  %v1071_v17 = vadd.f32 %v2263_v37, %v881_v14 }
 0x111   : > { %v1596_v18 = vpack.c.bf16 %v1120_v16, %v1120_v16  ;;  %v1121_v19 = vmax.f32 %v1071_v17, 0.0  ;;  %v571_v20 = vpop.f32.mrb[12].mxu0 }
 0x112   : > { %v885_v21 = vpop.f32.mrb[12].mxu1  ;;  %v1738_v22 = vpop.f32.mrb[13].mxu0 }
 0x113   : > { %1371 = vst.msk [vmem:[%s2271_s30 + $0x10] sm:$0xf] %vm1366_vm2, %v1596_v18  ;;  %v1597_v23 = vpack.c.bf16 %v1121_v19, %v1121_v19  ;;  %v886_v24 = vadd.f32 %v885_v21, %v571_v20  ;;  %v1854_v25 = vpop.f32.mrb[13].mxu1  ;;  %v574_v26 = vpop.f32.mrb[14].mxu0 }
 0x114   : > { %v888_v27 = vpop.f32.mrb[14].mxu1  ;;  %v1739_v28 = vpop.f32.mrb[15].mxu0 }
 0x115   : > { %1372 = vst.msk [vmem:[%s2271_s30 + $0x14] sm:$0xf] %vm1366_vm2, %v1597_v23  ;;  %v1072_v29 = vadd.f32 %v2263_v37, %v886_v24  ;;  %v889_v30 = vadd.f32 %v888_v27, %v574_v26  ;;  %v1855_v31 = vpop.f32.mrb[15].mxu1 }
 0x117   : > { %v1122_v32 = vmax.f32 %v1072_v29, 0.0  ;;  %v1073_v33 = vadd.f32 %v2263_v37, %v889_v30 }
 0x119   : > { %v1598_v34 = vpack.c.bf16 %v1122_v32, %v1122_v32  ;;  %v1123_v35 = vmax.f32 %v1073_v33, 0.0  ;;  %v579_v36 = vpop.f32.mrb[16].mxu0 }
 0x11a   : > { %v893_v38 = vpop.f32.mrb[16].mxu1  ;;  %v1742_v39 = vpop.f32.mrb[17].mxu0 }
 0x11b   : > { %1373 = vst.msk [vmem:[%s2271_s30 + $0x18] sm:$0xf] %vm1366_vm2, %v1598_v34  ;;  %v1599_v40 = vpack.c.bf16 %v1123_v35, %v1123_v35  ;;  %v894_v41 = vadd.f32 %v893_v38, %v579_v36  ;;  %v1858_v42 = vpop.f32.mrb[17].mxu1  ;;  %v582_v43 = vpop.f32.mrb[18].mxu0 }
 0x11c   : > { %v896_v44 = vpop.f32.mrb[18].mxu1  ;;  %v1743_v1 = vpop.f32.mrb[19].mxu0 }
 0x11d   : > { %1374 = vst.msk [vmem:[%s2271_s30 + $0x1c] sm:$0xf] %vm1366_vm2, %v1599_v40  ;;  %v1074_v45 = vadd.f32 %v2263_v37, %v894_v41  ;;  %v897_v46 = vadd.f32 %v896_v44, %v582_v43  ;;  %v1859_v47 = vpop.f32.mrb[19].mxu1 }
 0x11f   : > { %v1124_v48 = vmax.f32 %v1074_v45, 0.0  ;;  %v1075_v49 = vadd.f32 %v2263_v37, %v897_v46 }
 0x121   : > { %v1600_v50 = vpack.c.bf16 %v1124_v48, %v1124_v48  ;;  %v1125_v51 = vmax.f32 %v1075_v49, 0.0  ;;  %v587_v52 = vpop.f32.mrb[20].mxu0 }
 0x122   : > { %v901_v53 = vpop.f32.mrb[20].mxu1  ;;  %v1746_v54 = vpop.f32.mrb[21].mxu0 }
 0x123   : > { %1375 = vst.msk [vmem:[%s2271_s30 + $0x20] sm:$0xf] %vm1366_vm2, %v1600_v50  ;;  %v1601_v55 = vpack.c.bf16 %v1125_v51, %v1125_v51  ;;  %v902_v56 = vadd.f32 %v901_v53, %v587_v52  ;;  %v1862_v57 = vpop.f32.mrb[21].mxu1  ;;  %v590_v58 = vpop.f32.mrb[22].mxu0 }
 0x124   : > { %v904_v59 = vpop.f32.mrb[22].mxu1  ;;  %v1747_v60 = vpop.f32.mrb[23].mxu0 }
 0x125   : > { %1376 = vst.msk [vmem:[%s2271_s30 + $0x24] sm:$0xf] %vm1366_vm2, %v1601_v55  ;;  %v1076_v61 = vadd.f32 %v2263_v37, %v902_v56  ;;  %v905_v62 = vadd.f32 %v904_v59, %v590_v58  ;;  %v1863_v63 = vpop.f32.mrb[23].mxu1 }
 0x127   : > { %v1126_v0 = vmax.f32 %v1076_v61, 0.0  ;;  %v1077_v2 = vadd.f32 %v2263_v37, %v905_v62 }
 0x129   : > { %v1602_v3 = vpack.c.bf16 %v1126_v0, %v1126_v0  ;;  %v1127_v4 = vmax.f32 %v1077_v2, 0.0  ;;  %v595_v5 = vpop.f32.mrb[24].mxu0 }
 0x12a   : > { %v909_v6 = vpop.f32.mrb[24].mxu1  ;;  %v1750_v7 = vpop.f32.mrb[25].mxu0 }
 0x12b   : > { %1377 = vst.msk [vmem:[%s2271_s30 + $0x28] sm:$0xf] %vm1366_vm2, %v1602_v3  ;;  %v1603_v8 = vpack.c.bf16 %v1127_v4, %v1127_v4  ;;  %v910_v9 = vadd.f32 %v909_v6, %v595_v5  ;;  %v1866_v10 = vpop.f32.mrb[25].mxu1  ;;  %v598_v11 = vpop.f32.mrb[26].mxu0 }
 0x12c   : > { %v912_v12 = vpop.f32.mrb[26].mxu1  ;;  %v1751_v13 = vpop.f32.mrb[27].mxu0 }
 0x12d   : > { %1378 = vst.msk [vmem:[%s2271_s30 + $0x2c] sm:$0xf] %vm1366_vm2, %v1603_v8  ;;  %v1078_v14 = vadd.f32 %v2263_v37, %v910_v9  ;;  %v913_v15 = vadd.f32 %v912_v12, %v598_v11  ;;  %v1867_v16 = vpop.f32.mrb[27].mxu1 }
 0x12f   : > { %v1128_v17 = vmax.f32 %v1078_v14, 0.0  ;;  %v1079_v18 = vadd.f32 %v2263_v37, %v913_v15 }
 0x131   : > { %v1604_v19 = vpack.c.bf16 %v1128_v17, %v1128_v17  ;;  %v1129_v20 = vmax.f32 %v1079_v18, 0.0  ;;  %v603_v21 = vpop.f32.mrb[28].mxu0 }
 0x132   : > { %v917_v22 = vpop.f32.mrb[28].mxu1  ;;  %v1754_v23 = vpop.f32.mrb[29].mxu0 }
 0x133   : > { %1379 = vst.msk [vmem:[%s2271_s30 + $0x30] sm:$0xf] %vm1366_vm2, %v1604_v19  ;;  %v1605_v24 = vpack.c.bf16 %v1129_v20, %v1129_v20  ;;  %v918_v25 = vadd.f32 %v917_v22, %v603_v21  ;;  %v1870_v26 = vpop.f32.mrb[29].mxu1  ;;  %v606_v27 = vpop.f32.mrb[30].mxu0 }
 0x134   : > { %v920_v28 = vpop.f32.mrb[30].mxu1  ;;  %v1755_v29 = vpop.f32.mrb[31].mxu0 }
 0x135   : > { %1380 = vst.msk [vmem:[%s2271_s30 + $0x34] sm:$0xf] %vm1366_vm2, %v1605_v24  ;;  %v1080_v30 = vadd.f32 %v2263_v37, %v918_v25  ;;  %v921_v31 = vadd.f32 %v920_v28, %v606_v27  ;;  %v1871_v32 = vpop.f32.mrb[31].mxu1 }
 0x137   : > { %v1130_v33 = vmax.f32 %v1080_v30, 0.0  ;;  %v1081_v34 = vadd.f32 %v2263_v37, %v921_v31 }
 0x139   : > { %v1606_v35 = vpack.c.bf16 %v1130_v33, %v1130_v33  ;;  %v1131_v36 = vmax.f32 %v1081_v34, 0.0  ;;  %v611_v38 = vpop.f32.mrb[32].mxu0 }
 0x13a   : > { %v925_v39 = vpop.f32.mrb[32].mxu1  ;;  %v1758_v40 = vpop.f32.mrb[33].mxu0 }
 0x13b   : > { %1381 = vst.msk [vmem:[%s2271_s30 + $0x38] sm:$0xf] %vm1366_vm2, %v1606_v35  ;;  %v1607_v41 = vpack.c.bf16 %v1131_v36, %v1131_v36  ;;  %v926_v42 = vadd.f32 %v925_v39, %v611_v38  ;;  %v1874_v43 = vpop.f32.mrb[33].mxu1  ;;  %v614_v44 = vpop.f32.mrb[34].mxu0 }
 0x13c   : > { %v928_v1 = vpop.f32.mrb[34].mxu1  ;;  %v1759_v45 = vpop.f32.mrb[35].mxu0 }
 0x13d   : > { %1382 = vst.msk [vmem:[%s2271_s30 + $0x3c] sm:$0xf] %vm1366_vm2, %v1607_v41  ;;  %v1082_v46 = vadd.f32 %v2263_v37, %v926_v42  ;;  %v929_v47 = vadd.f32 %v928_v1, %v614_v44  ;;  %v1875_v48 = vpop.f32.mrb[35].mxu1 }
 0x13f   : > { %v1132_v49 = vmax.f32 %v1082_v46, 0.0  ;;  %v1083_v50 = vadd.f32 %v2263_v37, %v929_v47 }
 0x141   : > { %v1608_v51 = vpack.c.bf16 %v1132_v49, %v1132_v49  ;;  %v1133_v52 = vmax.f32 %v1083_v50, 0.0  ;;  %v619_v53 = vpop.f32.mrb[36].mxu0 }
 0x142   : > { %v933_v54 = vpop.f32.mrb[36].mxu1  ;;  %v1762_v55 = vpop.f32.mrb[37].mxu0 }
 0x143   : > { %1383 = vst.msk [vmem:[%s2271_s30 + $0x40] sm:$0xf] %vm1366_vm2, %v1608_v51  ;;  %v1609_v56 = vpack.c.bf16 %v1133_v52, %v1133_v52  ;;  %v934_v57 = vadd.f32 %v933_v54, %v619_v53  ;;  %v1878_v58 = vpop.f32.mrb[37].mxu1  ;;  %v622_v59 = vpop.f32.mrb[38].mxu0 }
 0x144   : > { %v936_v60 = vpop.f32.mrb[38].mxu1  ;;  %v1763_v61 = vpop.f32.mrb[39].mxu0 }
 0x145   : > { %1384 = vst.msk [vmem:[%s2271_s30 + $0x44] sm:$0xf] %vm1366_vm2, %v1609_v56  ;;  %v1084_v62 = vadd.f32 %v2263_v37, %v934_v57  ;;  %v937_v63 = vadd.f32 %v936_v60, %v622_v59  ;;  %v1879_v0 = vpop.f32.mrb[39].mxu1 }
 0x147   : > { %v1134_v2 = vmax.f32 %v1084_v62, 0.0  ;;  %v1085_v3 = vadd.f32 %v2263_v37, %v937_v63 }
 0x149   : > { %v1610_v4 = vpack.c.bf16 %v1134_v2, %v1134_v2  ;;  %v1135_v5 = vmax.f32 %v1085_v3, 0.0  ;;  %v627_v6 = vpop.f32.mrb[40].mxu0 }
 0x14a   : > { %v941_v7 = vpop.f32.mrb[40].mxu1  ;;  %v1766_v8 = vpop.f32.mrb[41].mxu0 }
 0x14b   : > { %1385 = vst.msk [vmem:[%s2271_s30 + $0x48] sm:$0xf] %vm1366_vm2, %v1610_v4  ;;  %v1611_v9 = vpack.c.bf16 %v1135_v5, %v1135_v5  ;;  %v942_v10 = vadd.f32 %v941_v7, %v627_v6  ;;  %v1882_v11 = vpop.f32.mrb[41].mxu1  ;;  %v630_v12 = vpop.f32.mrb[42].mxu0 }
 0x14c   : > { %v944_v13 = vpop.f32.mrb[42].mxu1  ;;  %v1767_v14 = vpop.f32.mrb[43].mxu0 }
 0x14d   : > { %1386 = vst.msk [vmem:[%s2271_s30 + $0x4c] sm:$0xf] %vm1366_vm2, %v1611_v9  ;;  %v1086_v15 = vadd.f32 %v2263_v37, %v942_v10  ;;  %v945_v16 = vadd.f32 %v944_v13, %v630_v12  ;;  %v1883_v17 = vpop.f32.mrb[43].mxu1 }
 0x14f   : > { %v1136_v18 = vmax.f32 %v1086_v15, 0.0  ;;  %v1087_v19 = vadd.f32 %v2263_v37, %v945_v16 }
 0x151   : > { %v1612_v20 = vpack.c.bf16 %v1136_v18, %v1136_v18  ;;  %v1137_v21 = vmax.f32 %v1087_v19, 0.0  ;;  %v635_v22 = vpop.f32.mrb[44].mxu0 }
 0x152   : > { %v949_v23 = vpop.f32.mrb[44].mxu1  ;;  %v1770_v24 = vpop.f32.mrb[45].mxu0 }
 0x153   : > { %1387 = vst.msk [vmem:[%s2271_s30 + $0x50] sm:$0xf] %vm1366_vm2, %v1612_v20  ;;  %v1613_v25 = vpack.c.bf16 %v1137_v21, %v1137_v21  ;;  %v950_v26 = vadd.f32 %v949_v23, %v635_v22  ;;  %v1886_v27 = vpop.f32.mrb[45].mxu1  ;;  %v638_v28 = vpop.f32.mrb[46].mxu0 }
 0x154   : > { %v952_v29 = vpop.f32.mrb[46].mxu1  ;;  %v1771_v30 = vpop.f32.mrb[47].mxu0 }
 0x155   : > { %1388 = vst.msk [vmem:[%s2271_s30 + $0x54] sm:$0xf] %vm1366_vm2, %v1613_v25  ;;  %v1088_v31 = vadd.f32 %v2263_v37, %v950_v26  ;;  %v953_v32 = vadd.f32 %v952_v29, %v638_v28  ;;  %v1887_v33 = vpop.f32.mrb[47].mxu1 }
 0x157   : > { %v1138_v34 = vmax.f32 %v1088_v31, 0.0  ;;  %v1089_v35 = vadd.f32 %v2263_v37, %v953_v32 }
 0x159   : > { %v1614_v36 = vpack.c.bf16 %v1138_v34, %v1138_v34  ;;  %v1139_v38 = vmax.f32 %v1089_v35, 0.0  ;;  %v643_v39 = vpop.f32.mrb[48].mxu0 }
 0x15a   : > { %v957_v40 = vpop.f32.mrb[48].mxu1  ;;  %v1774_v41 = vpop.f32.mrb[49].mxu0 }
 0x15b   : > { %1389 = vst.msk [vmem:[%s2271_s30 + $0x58] sm:$0xf] %vm1366_vm2, %v1614_v36  ;;  %v1615_v42 = vpack.c.bf16 %v1139_v38, %v1139_v38  ;;  %v958_v43 = vadd.f32 %v957_v40, %v643_v39  ;;  %v1890_v44 = vpop.f32.mrb[49].mxu1  ;;  %v646_v1 = vpop.f32.mrb[50].mxu0 }
 0x15c   : > { %v960_v45 = vpop.f32.mrb[50].mxu1  ;;  %v1775_v46 = vpop.f32.mrb[51].mxu0 }
 0x15d   : > { %1390 = vst.msk [vmem:[%s2271_s30 + $0x5c] sm:$0xf] %vm1366_vm2, %v1615_v42  ;;  %v1090_v47 = vadd.f32 %v2263_v37, %v958_v43  ;;  %v961_v48 = vadd.f32 %v960_v45, %v646_v1  ;;  %v1891_v49 = vpop.f32.mrb[51].mxu1 }
 0x15f   : > { %v1140_v50 = vmax.f32 %v1090_v47, 0.0  ;;  %v1091_v51 = vadd.f32 %v2263_v37, %v961_v48 }
 0x161   : > { %v1616_v52 = vpack.c.bf16 %v1140_v50, %v1140_v50  ;;  %v1141_v53 = vmax.f32 %v1091_v51, 0.0  ;;  %v651_v54 = vpop.f32.mrb[52].mxu0 }
 0x162   : > { %v965_v55 = vpop.f32.mrb[52].mxu1  ;;  %v1778_v56 = vpop.f32.mrb[53].mxu0 }
 0x163   : > { %1391 = vst.msk [vmem:[%s2271_s30 + $0x60] sm:$0xf] %vm1366_vm2, %v1616_v52  ;;  %v1617_v57 = vpack.c.bf16 %v1141_v53, %v1141_v53  ;;  %v966_v58 = vadd.f32 %v965_v55, %v651_v54  ;;  %v1894_v59 = vpop.f32.mrb[53].mxu1  ;;  %v654_v60 = vpop.f32.mrb[54].mxu0 }
 0x164   : > { %v968_v61 = vpop.f32.mrb[54].mxu1  ;;  %v1779_v62 = vpop.f32.mrb[55].mxu0 }
 0x165   : > { %1392 = vst.msk [vmem:[%s2271_s30 + $0x64] sm:$0xf] %vm1366_vm2, %v1617_v57  ;;  %v1092_v63 = vadd.f32 %v2263_v37, %v966_v58  ;;  %v969_v0 = vadd.f32 %v968_v61, %v654_v60  ;;  %v1895_v2 = vpop.f32.mrb[55].mxu1 }
 0x167   : > { %v1142_v3 = vmax.f32 %v1092_v63, 0.0  ;;  %v1093_v4 = vadd.f32 %v2263_v37, %v969_v0 }
 0x169   : > { %v1618_v5 = vpack.c.bf16 %v1142_v3, %v1142_v3  ;;  %v1143_v6 = vmax.f32 %v1093_v4, 0.0  ;;  %v659_v7 = vpop.f32.mrb[56].mxu0 }
 0x16a   : > { %v973_v8 = vpop.f32.mrb[56].mxu1  ;;  %v1782_v9 = vpop.f32.mrb[57].mxu0 }
 0x16b   : > { %1393 = vst.msk [vmem:[%s2271_s30 + $0x68] sm:$0xf] %vm1366_vm2, %v1618_v5  ;;  %v1619_v10 = vpack.c.bf16 %v1143_v6, %v1143_v6  ;;  %v974_v11 = vadd.f32 %v973_v8, %v659_v7  ;;  %v1898_v12 = vpop.f32.mrb[57].mxu1  ;;  %v662_v13 = vpop.f32.mrb[58].mxu0 }
 0x16c   : > { %v976_v14 = vpop.f32.mrb[58].mxu1  ;;  %v1783_v15 = vpop.f32.mrb[59].mxu0 }
 0x16d   : > { %1394 = vst.msk [vmem:[%s2271_s30 + $0x6c] sm:$0xf] %vm1366_vm2, %v1619_v10  ;;  %v1094_v16 = vadd.f32 %v2263_v37, %v974_v11  ;;  %v977_v17 = vadd.f32 %v976_v14, %v662_v13  ;;  %v1899_v18 = vpop.f32.mrb[59].mxu1 }
 0x16f   : > { %v1144_v19 = vmax.f32 %v1094_v16, 0.0  ;;  %v1095_v20 = vadd.f32 %v2263_v37, %v977_v17 }
 0x171   : > { %v1620_v21 = vpack.c.bf16 %v1144_v19, %v1144_v19  ;;  %v1145_v22 = vmax.f32 %v1095_v20, 0.0  ;;  %v667_v23 = vpop.f32.mrb[60].mxu0 }
 0x172   : > { %v981_v24 = vpop.f32.mrb[60].mxu1  ;;  %v1786_v25 = vpop.f32.mrb[61].mxu0 }
 0x173   : > { %1395 = vst.msk [vmem:[%s2271_s30 + $0x70] sm:$0xf] %vm1366_vm2, %v1620_v21  ;;  %v1621_v26 = vpack.c.bf16 %v1145_v22, %v1145_v22  ;;  %v982_v27 = vadd.f32 %v981_v24, %v667_v23  ;;  %v1902_v28 = vpop.f32.mrb[61].mxu1  ;;  %v670_v29 = vpop.f32.mrb[62].mxu0 }
 0x174   : > { %v984_v30 = vpop.f32.mrb[62].mxu1  ;;  %v1787_v31 = vpop.f32.mrb[63].mxu0 }
 0x175   : > { %1396 = vst.msk [vmem:[%s2271_s30 + $0x74] sm:$0xf] %vm1366_vm2, %v1621_v26  ;;  %v1096_v32 = vadd.f32 %v2263_v37, %v982_v27  ;;  %v985_v33 = vadd.f32 %v984_v30, %v670_v29  ;;  %v1903_v34 = vpop.f32.mrb[63].mxu1 }
 0x177   : > { %v1146_v35 = vmax.f32 %v1096_v32, 0.0  ;;  %v1097_v36 = vadd.f32 %v2263_v37, %v985_v33 }
 0x179   : > { %v1622_v38 = vpack.c.bf16 %v1146_v35, %v1146_v35  ;;  %v1147_v39 = vmax.f32 %v1097_v36, 0.0  ;;  %v675_v40 = vpop.f32.mrb[64].mxu0 }
 0x17a   : > { %v989_v41 = vpop.f32.mrb[64].mxu1  ;;  %v1790_v42 = vpop.f32.mrb[65].mxu0 }
 0x17b   : > { %1397 = vst.msk [vmem:[%s2271_s30 + $0x78] sm:$0xf] %vm1366_vm2, %v1622_v38  ;;  %v1623_v43 = vpack.c.bf16 %v1147_v39, %v1147_v39  ;;  %v990_v44 = vadd.f32 %v989_v41, %v675_v40  ;;  %v1906_v1 = vpop.f32.mrb[65].mxu1  ;;  %v678_v45 = vpop.f32.mrb[66].mxu0 }
 0x17c   : > { %v992_v46 = vpop.f32.mrb[66].mxu1  ;;  %v1791_v47 = vpop.f32.mrb[67].mxu0 }
 0x17d   : > { %1398 = vst.msk [vmem:[%s2271_s30 + $0x7c] sm:$0xf] %vm1366_vm2, %v1623_v43  ;;  %v1098_v48 = vadd.f32 %v2263_v37, %v990_v44  ;;  %v993_v49 = vadd.f32 %v992_v46, %v678_v45  ;;  %v1907_v50 = vpop.f32.mrb[67].mxu1 }
 0x17f   : > { %v1148_v51 = vmax.f32 %v1098_v48, 0.0  ;;  %v1099_v52 = vadd.f32 %v2263_v37, %v993_v49 }
 0x181   : > { %v1624_v53 = vpack.c.bf16 %v1148_v51, %v1148_v51  ;;  %v1149_v54 = vmax.f32 %v1099_v52, 0.0  ;;  %v683_v55 = vpop.f32.mrb[68].mxu0 }
 0x182   : > { %v997_v56 = vpop.f32.mrb[68].mxu1  ;;  %v1794_v57 = vpop.f32.mrb[69].mxu0 }
 0x183   : > { %1399 = vst.msk [vmem:[%s2271_s30 + $0x80] sm:$0xf] %vm1366_vm2, %v1624_v53  ;;  %v1625_v58 = vpack.c.bf16 %v1149_v54, %v1149_v54  ;;  %v998_v59 = vadd.f32 %v997_v56, %v683_v55  ;;  %v1910_v60 = vpop.f32.mrb[69].mxu1  ;;  %v686_v61 = vpop.f32.mrb[70].mxu0 }
 0x184   : > { %v1000_v62 = vpop.f32.mrb[70].mxu1  ;;  %v1795_v63 = vpop.f32.mrb[71].mxu0 }
 0x185   : > { %1400 = vst.msk [vmem:[%s2271_s30 + $0x84] sm:$0xf] %vm1366_vm2, %v1625_v58  ;;  %v1100_v0 = vadd.f32 %v2263_v37, %v998_v59  ;;  %v1001_v2 = vadd.f32 %v1000_v62, %v686_v61  ;;  %v1911_v3 = vpop.f32.mrb[71].mxu1 }
 0x187   : > { %v1150_v4 = vmax.f32 %v1100_v0, 0.0  ;;  %v1101_v5 = vadd.f32 %v2263_v37, %v1001_v2 }
 0x189   : > { %v1626_v6 = vpack.c.bf16 %v1150_v4, %v1150_v4  ;;  %v1151_v7 = vmax.f32 %v1101_v5, 0.0  ;;  %v691_v8 = vpop.f32.mrb[72].mxu0 }
 0x18a   : > { %v1005_v9 = vpop.f32.mrb[72].mxu1  ;;  %v1798_v10 = vpop.f32.mrb[73].mxu0 }
 0x18b   : > { %1401 = vst.msk [vmem:[%s2271_s30 + $0x88] sm:$0xf] %vm1366_vm2, %v1626_v6  ;;  %v1627_v11 = vpack.c.bf16 %v1151_v7, %v1151_v7  ;;  %v1006_v12 = vadd.f32 %v1005_v9, %v691_v8  ;;  %v1914_v13 = vpop.f32.mrb[73].mxu1  ;;  %v694_v14 = vpop.f32.mrb[74].mxu0 }
 0x18c   : > { %v1008_v15 = vpop.f32.mrb[74].mxu1  ;;  %v1799_v16 = vpop.f32.mrb[75].mxu0 }
 0x18d   : > { %1402 = vst.msk [vmem:[%s2271_s30 + $0x8c] sm:$0xf] %vm1366_vm2, %v1627_v11  ;;  %v1102_v17 = vadd.f32 %v2263_v37, %v1006_v12  ;;  %v1009_v18 = vadd.f32 %v1008_v15, %v694_v14  ;;  %v1915_v19 = vpop.f32.mrb[75].mxu1 }
 0x18f   : > { %v1152_v20 = vmax.f32 %v1102_v17, 0.0  ;;  %v1103_v21 = vadd.f32 %v2263_v37, %v1009_v18 }
 0x191   : > { %v1628_v22 = vpack.c.bf16 %v1152_v20, %v1152_v20  ;;  %v1153_v23 = vmax.f32 %v1103_v21, 0.0  ;;  %v699_v24 = vpop.f32.mrb[76].mxu0 }
 0x192   : > { %v1013_v25 = vpop.f32.mrb[76].mxu1  ;;  %v1802_v26 = vpop.f32.mrb[77].mxu0 }
 0x193   : > { %1403 = vst.msk [vmem:[%s2271_s30 + $0x90] sm:$0xf] %vm1366_vm2, %v1628_v22  ;;  %v1629_v27 = vpack.c.bf16 %v1153_v23, %v1153_v23  ;;  %v1014_v28 = vadd.f32 %v1013_v25, %v699_v24  ;;  %v1918_v29 = vpop.f32.mrb[77].mxu1  ;;  %v702_v30 = vpop.f32.mrb[78].mxu0 }
 0x194   : > { %v1016_v31 = vpop.f32.mrb[78].mxu1  ;;  %v1803_v32 = vpop.f32.mrb[79].mxu0 }
 0x195   : > { %1404 = vst.msk [vmem:[%s2271_s30 + $0x94] sm:$0xf] %vm1366_vm2, %v1629_v27  ;;  %v1104_v33 = vadd.f32 %v2263_v37, %v1014_v28  ;;  %v1017_v34 = vadd.f32 %v1016_v31, %v702_v30  ;;  %v1919_v35 = vpop.f32.mrb[79].mxu1 }
 0x197   : > { %v1154_v36 = vmax.f32 %v1104_v33, 0.0  ;;  %v1105_v38 = vadd.f32 %v2263_v37, %v1017_v34 }
 0x199   : > { %v1630_v39 = vpack.c.bf16 %v1154_v36, %v1154_v36  ;;  %v1155_v40 = vmax.f32 %v1105_v38, 0.0  ;;  %v707_v41 = vpop.f32.mrb[80].mxu0 }
 0x19a   : > { %v1021_v42 = vpop.f32.mrb[80].mxu1  ;;  %v1806_v43 = vpop.f32.mrb[81].mxu0 }
 0x19b   : > { %1405 = vst.msk [vmem:[%s2271_s30 + $0x98] sm:$0xf] %vm1366_vm2, %v1630_v39  ;;  %v1631_v44 = vpack.c.bf16 %v1155_v40, %v1155_v40  ;;  %v1022_v1 = vadd.f32 %v1021_v42, %v707_v41  ;;  %v1922_v45 = vpop.f32.mrb[81].mxu1  ;;  %v710_v46 = vpop.f32.mrb[82].mxu0 }
 0x19c   : > { %v1024_v47 = vpop.f32.mrb[82].mxu1  ;;  %v1807_v48 = vpop.f32.mrb[83].mxu0 }
 0x19d   : > { %1406 = vst.msk [vmem:[%s2271_s30 + $0x9c] sm:$0xf] %vm1366_vm2, %v1631_v44  ;;  %v1106_v49 = vadd.f32 %v2263_v37, %v1022_v1  ;;  %v1025_v50 = vadd.f32 %v1024_v47, %v710_v46  ;;  %v1923_v51 = vpop.f32.mrb[83].mxu1 }
 0x19f   : > { %v1156_v52 = vmax.f32 %v1106_v49, 0.0  ;;  %v1107_v53 = vadd.f32 %v2263_v37, %v1025_v50 }
 0x1a1   : > { %v1632_v54 = vpack.c.bf16 %v1156_v52, %v1156_v52  ;;  %v1157_v55 = vmax.f32 %v1107_v53, 0.0  ;;  %v715_v56 = vpop.f32.mrb[84].mxu0 }
 0x1a2   : > { %v1029_v57 = vpop.f32.mrb[84].mxu1  ;;  %v1810_v58 = vpop.f32.mrb[85].mxu0 }
 0x1a3   : > { %1407 = vst.msk [vmem:[%s2271_s30 + $0xa0] sm:$0xf] %vm1366_vm2, %v1632_v54  ;;  %v1633_v59 = vpack.c.bf16 %v1157_v55, %v1157_v55  ;;  %v1030_v60 = vadd.f32 %v1029_v57, %v715_v56  ;;  %v1926_v61 = vpop.f32.mrb[85].mxu1  ;;  %v718_v62 = vpop.f32.mrb[86].mxu0 }
 0x1a4   : > { %v1032_v63 = vpop.f32.mrb[86].mxu1  ;;  %v1811_v0 = vpop.f32.mrb[87].mxu0 }
 0x1a5   : > { %1408 = vst.msk [vmem:[%s2271_s30 + $0xa4] sm:$0xf] %vm1366_vm2, %v1633_v59  ;;  %v1108_v2 = vadd.f32 %v2263_v37, %v1030_v60  ;;  %v1033_v3 = vadd.f32 %v1032_v63, %v718_v62  ;;  %v1927_v4 = vpop.f32.mrb[87].mxu1 }
 0x1a7   : > { %v1158_v5 = vmax.f32 %v1108_v2, 0.0  ;;  %v1109_v6 = vadd.f32 %v2263_v37, %v1033_v3 }
 0x1a9   : > { %v1634_v7 = vpack.c.bf16 %v1158_v5, %v1158_v5  ;;  %v1159_v8 = vmax.f32 %v1109_v6, 0.0  ;;  %v723_v9 = vpop.f32.mrb[88].mxu0 }
 0x1aa   : > { %v1037_v10 = vpop.f32.mrb[88].mxu1  ;;  %v1814_v11 = vpop.f32.mrb[89].mxu0 }
 0x1ab   : > { %1409 = vst.msk [vmem:[%s2271_s30 + $0xa8] sm:$0xf] %vm1366_vm2, %v1634_v7  ;;  %v1635_v12 = vpack.c.bf16 %v1159_v8, %v1159_v8  ;;  %v1038_v13 = vadd.f32 %v1037_v10, %v723_v9  ;;  %v1930_v14 = vpop.f32.mrb[89].mxu1  ;;  %v726_v15 = vpop.f32.mrb[90].mxu0 }
 0x1ac   : > { %v1040_v16 = vpop.f32.mrb[90].mxu1  ;;  %v1815_v17 = vpop.f32.mrb[91].mxu0 }
 0x1ad   : > { %1410 = vst.msk [vmem:[%s2271_s30 + $0xac] sm:$0xf] %vm1366_vm2, %v1635_v12  ;;  %v1110_v18 = vadd.f32 %v2263_v37, %v1038_v13  ;;  %v1041_v19 = vadd.f32 %v1040_v16, %v726_v15  ;;  %v1931_v20 = vpop.f32.mrb[91].mxu1 }
 0x1af   : > { %v1160_v21 = vmax.f32 %v1110_v18, 0.0  ;;  %v1111_v22 = vadd.f32 %v2263_v37, %v1041_v19 }
 0x1b1   : > { %v1636_v23 = vpack.c.bf16 %v1160_v21, %v1160_v21  ;;  %v1161_v24 = vmax.f32 %v1111_v22, 0.0  ;;  %v731_v25 = vpop.f32.mrb[92].mxu0 }
 0x1b2   : > { %v1045_v26 = vpop.f32.mrb[92].mxu1  ;;  %v1818_v27 = vpop.f32.mrb[93].mxu0 }
 0x1b3   : > { %1411 = vst.msk [vmem:[%s2271_s30 + $0xb0] sm:$0xf] %vm1366_vm2, %v1636_v23  ;;  %v1637_v28 = vpack.c.bf16 %v1161_v24, %v1161_v24  ;;  %v1046_v29 = vadd.f32 %v1045_v26, %v731_v25  ;;  %v1934_v30 = vpop.f32.mrb[93].mxu1  ;;  %v734_v31 = vpop.f32.mrb[94].mxu0 }
 0x1b4   : > { %v1048_v32 = vpop.f32.mrb[94].mxu1  ;;  %v1819_v33 = vpop.f32.mrb[95].mxu0 }
 0x1b5   : > { %1412 = vst.msk [vmem:[%s2271_s30 + $0xb4] sm:$0xf] %vm1366_vm2, %v1637_v28  ;;  %v1112_v34 = vadd.f32 %v2263_v37, %v1046_v29  ;;  %v1049_v35 = vadd.f32 %v1048_v32, %v734_v31  ;;  %v1935_v36 = vpop.f32.mrb[95].mxu1 }
 0x1b7   : > { %v1162_v38 = vmax.f32 %v1112_v34, 0.0  ;;  %v1113_v39 = vadd.f32 %v2263_v37, %v1049_v35 }
 0x1b9   : > { %v1638_v40 = vpack.c.bf16 %v1162_v38, %v1162_v38  ;;  %v1163_v41 = vmax.f32 %v1113_v39, 0.0  ;;  %v739_v42 = vpop.f32.mrb[96].mxu0 }
 0x1ba   : > { %v1053_v43 = vpop.f32.mrb[96].mxu1  ;;  %v1822_v44 = vpop.f32.mrb[97].mxu0 }
 0x1bb   : > { %1413 = vst.msk [vmem:[%s2271_s30 + $0xb8] sm:$0xf] %vm1366_vm2, %v1638_v40  ;;  %v1639_v1 = vpack.c.bf16 %v1163_v41, %v1163_v41  ;;  %v1054_v45 = vadd.f32 %v1053_v43, %v739_v42  ;;  %v1938_v46 = vpop.f32.mrb[97].mxu1  ;;  %v742_v47 = vpop.f32.mrb[98].mxu0 }
 0x1bc   : > { %v1056_v48 = vpop.f32.mrb[98].mxu1  ;;  %v1823_v49 = vpop.f32.mrb[99].mxu0 }
 0x1bd   : > { %1414 = vst.msk [vmem:[%s2271_s30 + $0xbc] sm:$0xf] %vm1366_vm2, %v1639_v1  ;;  %v1114_v50 = vadd.f32 %v2263_v37, %v1054_v45  ;;  %v1057_v51 = vadd.f32 %v1056_v48, %v742_v47  ;;  %v1939_v52 = vpop.f32.mrb[99].mxu1 }
 0x1bf   : > { %v1164_v53 = vmax.f32 %v1114_v50, 0.0  ;;  %v1115_v54 = vadd.f32 %v2263_v37, %v1057_v51 }
 0x1c1   : > { %v1640_v55 = vpack.c.bf16 %v1164_v53, %v1164_v53  ;;  %v1165_v56 = vmax.f32 %v1115_v54, 0.0 }
 0x1c3   : > { %1415 = vst.msk [vmem:[%s2271_s30 + $0xc0] sm:$0xf] %vm1366_vm2, %v1640_v55  ;;  %v1641_v57 = vpack.c.bf16 %v1165_v56, %v1165_v56 }
 0x1c5   : > { %1416 = vst.msk [vmem:[%s2271_s30 + $0xc4] sm:$0xf] %vm1366_vm2, %v1641_v57 }
 0x1c6 PF: > { %s13_s12 = sadd.s32 1, %s2002_s12  }
 0x1c7   : > { %p10_p4 = scmp.ge.s32.totalorder %s13_s12, 4  }
 0x1c9   :  { %12 = sbr.rel (!%p10_p4) target bundleno = 1 (0x1), region = 63 }

// kernel: nature_forward.4
= control target key start
LH: loop header
LB: loop body
LE: loop exit
PB: predicated region body
PF: predicated region fallthrough
CT: control target
= control target key end

     0   :  { %s1246_s12 = smov 0   ;;  %s1462_s0 = inlined_call_operand.vmem [shape: bf16[2,90,256], index: 0, kind: input, shape index: {}]   ;;  %s1463_s1 = inlined_call_operand.vmem [shape: bf16[2,256,64], index: 1, kind: input, shape index: {}]   ;;  %s1464_s2 = inlined_call_operand.vmem [shape: f32[1,64], index: 2, kind: input, shape index: {}]   ;;  %s1465_s3 = inlined_call_operand.vmem [shape: bf16[2,81,64], index: 3, kind: output, shape index: {}]  }
   0x1 LB: > { %s928_s13 = sadd.s32 4294967295, %s1224_s12   ;;  %p932_p0 = scmp.ge.s32.totalorder %s1224_s12, 1  ;;  %s1224_s12 = sphi %s1246_s12, %s13_s12  }
   0x2   : > { %p137_p1 = scmp.lt.s32.totalorder %s1224_s12, 3 }
   0x4   : > { %p138_p2 = pnand %p932_p0, %p137_p1 }
   0x5   : > { %v1162_v0 = vld [vmem:[%s1463_s1 + $0xc0] sm:$0xff] (!%p138_p2)   ;;  %v1166_v4 = vld [vmem:[%s1463_s1 + $0xc8] sm:$0xff] (!%p138_p2)   ;;  %v1170_v8 = vld [vmem:[%s1463_s1 + $0xd0] sm:$0xff] (!%p138_p2)   ;;  %p161_p3 = scmp.lt.s32.totalorder (!%p138_p2), %s928_s13, 1  ;;  %vm296_vm0 = vsmask.f32 (!%p138_p2), 7424 }
   0x6   : > { %141 = sbr.rel (%p138_p2) target bundleno = 305 (0x131), region = 32  ;;  %v1163_v1 = vld [vmem:[%s1463_s1 + $0x40] sm:$0xff] (!%p138_p2)   ;;  %1048 = vmatprep.subr.bf16.mxu0 (!%p138_p2), %v1162_v0  ;;  %v1167_v5 = vld [vmem:[%s1463_s1 + $0x48] sm:$0xff] (!%p138_p2)   ;;  %v1171_v9 = vld [vmem:[%s1463_s1 + $0x50] sm:$0xff] (!%p138_p2)   ;;  %vm856_vm1 = vcmask (!%p138_p2), 519168   ;;  %vm867_vm2 = vcmask (!%p138_p2), 516096  }
   0x7   : > { %v1164_v2 = vld [vmem:[%s1463_s1 + $0x80] sm:$0xff] (!%p138_p2)   ;;  %1100 = vmatprep.subr.bf16.mxu1 (!%p138_p2), %v1163_v1  ;;  %v1168_v6 = vld [vmem:[%s1463_s1 + $0x88] sm:$0xff] (!%p138_p2)   ;;  %v1172_v10 = vld [vmem:[%s1463_s1 + $0x90] sm:$0xff] (!%p138_p2)   ;;  %vm868_vm3 = vsmask.f32 (!%p138_p2), 256 }
   0x8   : > { %v1165_v3 = vld [vmem:[%s1463_s1] sm:$0xff] (!%p138_p2)   ;;  %1049 = vmatpush3.bf16.msra.mxu0 (!%p138_p2), %v1164_v2  ;;  %v1169_v7 = vld [vmem:[%s1463_s1 + $0x8] sm:$0xff] (!%p138_p2)   ;;  %v1173_v11 = vld [vmem:[%s1463_s1 + $0x10] sm:$0xff] (!%p138_p2)  }
   0x9   : > { %1101 = vmatpush3.bf16.msra.mxu1 (!%p138_p2), %v1165_v3  ;;  %1050 = vmatprep.subr.bf16.mxu0 (!%p138_p2), %v1166_v4  ;;  %v1174_v12 = vld [vmem:[%s1463_s1 + $0xd8] sm:$0xff] (!%p138_p2)   ;;  %v1178_v16 = vld [vmem:[%s1463_s1 + $0xe0] sm:$0xff] (!%p138_p2)   ;;  %v1182_v20 = vld [vmem:[%s1463_s1 + $0xe8] sm:$0xff] (!%p138_p2)  }
   0xa   : > { %1102 = vmatprep.subr.bf16.mxu1 (!%p138_p2), %v1167_v5  ;;  %v1175_v13 = vld [vmem:[%s1463_s1 + $0x58] sm:$0xff] (!%p138_p2)   ;;  %v1179_v17 = vld [vmem:[%s1463_s1 + $0x60] sm:$0xff] (!%p138_p2)   ;;  %v1183_v21 = vld [vmem:[%s1463_s1 + $0x68] sm:$0xff] (!%p138_p2)  }
   0xb   : > { %v1176_v14 = vld [vmem:[%s1463_s1 + $0x98] sm:$0xff] (!%p138_p2)   ;;  %v1180_v18 = vld [vmem:[%s1463_s1 + $0xa0] sm:$0xff] (!%p138_p2)   ;;  %v1184_v22 = vld [vmem:[%s1463_s1 + $0xa8] sm:$0xff] (!%p138_p2)  }
   0xc   : > { %1051 = vmatpush3.bf16.msra.mxu0 (!%p138_p2), %v1168_v6  ;;  %v1177_v15 = vld [vmem:[%s1463_s1 + $0x18] sm:$0xff] (!%p138_p2)   ;;  %v1181_v19 = vld [vmem:[%s1463_s1 + $0x20] sm:$0xff] (!%p138_p2)   ;;  %v1185_v23 = vld [vmem:[%s1463_s1 + $0x28] sm:$0xff] (!%p138_p2)  }
   0xd   : > { %1103 = vmatpush3.bf16.msra.mxu1 %v1169_v7  ;;  %1052 = vmatprep.subr.bf16.mxu0 %v1170_v8  ;;  %s1467_s13 = smov (!%p161_p3, %s928_s13), 1  ;;  %v1186_v24 = vld [vmem:[%s1463_s1 + $0xf0] sm:$0xff]   ;;  %v1190_v28 = vld [vmem:[%s1463_s1 + $0xf8] sm:$0xff]   ;;  %vm869_vm4 = vmand %vm867_vm2, %vm868_vm3 }
   0xe   : > { %1104 = vmatprep.subr.bf16.mxu1 %v1171_v9  ;;  %v1187_v25 = vld [vmem:[%s1463_s1 + $0x70] sm:$0xff]   ;;  %s1152_s16 = smul.u32 96, %s1467_s13  ;;  %v1191_v29 = vld [vmem:[%s1463_s1 + $0x78] sm:$0xff]  }
   0xf   : > { %v1188_v26 = vld [vmem:[%s1463_s1 + $0xb0] sm:$0xff]   ;;  %v1192_v30 = vld [vmem:[%s1463_s1 + $0xb8] sm:$0xff]   ;;  %s1153_s7 = smul.u32 44, %s1467_s13 }
  0x10   : > { %1053 = vmatpush3.bf16.msra.mxu0 %v1172_v10  ;;  %v1189_v27 = vld [vmem:[%s1463_s1 + $0x30] sm:$0xff]   ;;  %s1354_s27 = scalar_lea.vmem %s1462_s0, %s1152_s16  ;;  %v1193_v31 = vld [vmem:[%s1463_s1 + $0x38] sm:$0xff]  }
  0x11   : > { %1105 = vmatpush3.bf16.msra.mxu1 %v1173_v11  ;;  %1054 = vmatprep.subr.bf16.mxu0 %v1174_v12  ;;  %v174_v32 = vld [vmem:[%s1354_s27 + $0x8] sm:$0xff]  ;;  %v175_v33 = vld [vmem:[%s1354_s27 + $0x10] sm:$0xff]  ;;  %v176_v34 = vld [vmem:[%s1354_s27 + $0x18] sm:$0xff]  ;;  %s1426_s10 = scalar_lea.vmem %s1465_s3, %s1153_s7 }
  0x12   : > { %1106 = vmatprep.subr.bf16.mxu1 %v1175_v13  ;;  %v1366_v35 = vld [vmem:[%s1354_s27 + $0x20] sm:$0xff]  ;;  %v968_v36 = vcombine.high %v174_v32, %v175_v33  ;;  %v967_v38 = vcombine.low %v174_v32, %v175_v33  ;;  %v1370_v39 = vld [vmem:[%s1354_s27 + $0x28] sm:$0xff]  ;;  %v998_v40 = vcombine.high %v175_v33, %v176_v34  ;;  %v1375_v45 = vld [vmem:[%s1354_s27 + $0x30] sm:$0xff]  ;;  %v997_v1 = vcombine.low %v175_v33, %v176_v34 }
  0x13   : > { %v173_v37 = vld [vmem:[%s1354_s27] sm:$0xff]  ;;  %v970_v41 = vcombine.high %v176_v34, %v1366_v35  ;;  %v969_v44 = vcombine.low %v176_v34, %v1366_v35  ;;  %v1378_v50 = vld [vmem:[%s1354_s27 + $0x38] sm:$0xff]  ;;  %v972_v54 = vcombine.high %v1370_v39, %v1375_v45  ;;  %v971_v58 = vcombine.low %v1370_v39, %v1375_v45  ;;  %v182_v12 = vld [vmem:[%s1354_s27 + $0x48] sm:$0xff] }
  0x14   : > { %1055 = vmatpush3.bf16.msra.mxu0 %v1176_v14  ;;  %v995_v42 = vcombine.low %v173_v37, %v174_v32  ;;  %v996_v43 = vcombine.high %v173_v37, %v174_v32  ;;  %v310_v46 = vshrl.u32 %v968_v36, 16  ;;  %v312_v47 = vshll.u32 %v968_v36, 16  ;;  %v1381_v51 = vld [vmem:[%s1354_s27 + $0x40] sm:$0xff]  ;;  %v216_v13 = vld [vmem:[%s1354_s27 + $0x50] sm:$0xff] }
  0x15   : > { %1107 = vmatpush3.bf16.msra.mxu1 %v1177_v15  ;;  %1056 = vmatprep.subr.bf16.mxu0 %v1178_v16  ;;  %v298_v48 = vshrl.u32 %v967_v38, 16  ;;  %v300_v49 = vshll.u32 %v967_v38, 16  ;;  %v317_v52 = vshll.u32 %v970_v41, 16  ;;  %v305_v53 = vshll.u32 %v969_v44, 16 }
  0x16   : > { %1108 = vmatprep.subr.bf16.mxu1 %v1179_v17  ;;  %735 = vmatprep.mubr.bf16.mxu1 %v996_v43  ;;  %v329_v55 = vshrl.u32 %v970_v41, 16  ;;  %v314_v56 = vrot.slane %v312_v47, 1  ;;  %v333_v61 = vshll.u32 %v972_v54, 16  ;;  %v974_v62 = vcombine.high %v1378_v50, %v1381_v51 }
  0x17   : > { %v302_v57 = vrot.slane %v300_v49, 1  ;;  %v319_v59 = vrot.slane %v317_v52, 1  ;;  %v307_v60 = vrot.slane %v305_v53, 1  ;;  %v321_v4 = vshrl.u32 %v969_v44, 16  ;;  %v183_v49 = vld [vmem:[%s1354_s27 + $0x50] sm:$0x11] }
  0x18   : > { %1057 = vmatpush3.bf16.msra.mxu0 %v1180_v18  ;;  %v315_v63 = vor.u32 %v314_v56, %v310_v46  ;;  %v335_v3 = vrot.slane %v333_v61, 1  ;;  %v325_v5 = vshll.u32 %v971_v58, 16  ;;  %v345_v8 = vshrl.u32 %v972_v54, 16 }
  0x19   : > { %1109 = vmatpush3.bf16.msra.mxu1 %v1181_v19  ;;  %1058 = vmatprep.subr.bf16.mxu0 %v1182_v20  ;;  %v303_v0 = vor.u32 %v302_v57, %v298_v48  ;;  %v331_v2 = vor.u32 %v329_v55, %v319_v59  ;;  %v349_v9 = vshll.u32 %v974_v62, 16  ;;  %v1000_v11 = vcombine.high %v1366_v35, %v1370_v39 }
  0x1a   : > { %1110 = vmatprep.subr.bf16.mxu1 %v1183_v21  ;;  %v320_v6 = vsel %vm296_vm0, %v315_v63, %v319_v59  ;;  %v323_v14 = vor.u32 %v321_v4, %v307_v60  ;;  %v327_v15 = vrot.slane %v325_v5, 1  ;;  %v973_v16 = vcombine.low %v1378_v50, %v1381_v51 }
  0x1b   : > { %v308_v7 = vsel %vm296_vm0, %v303_v0, %v307_v60  ;;  %529 = vmatprep.mubr.bf16.mxu0 %v320_v6  ;;  %v336_v10 = vsel %vm296_vm0, %v331_v2, %v335_v3  ;;  %v347_v17 = vor.u32 %v345_v8, %v335_v3  ;;  %v351_v18 = vrot.slane %v349_v9, 1  ;;  %v1418_v8 = vld [vmem:[%s1464_s2] ss:$0 sm:$0xff] }
  0x1c   : > { %1059 = vmatpush3.bf16.msra.mxu0 %v1184_v22  ;;  %v976_v19 = vcombine.high %v182_v12, %v216_v13  ;;  %v328_v20 = vsel %vm296_vm0, %v323_v14, %v327_v15  ;;  %v337_v21 = vshrl.u32 %v971_v58, 16  ;;  %v341_v22 = vshll.u32 %v973_v16, 16 }
  0x1d   : > { %1111 = vmatpush3.bf16.msra.mxu1 %v1185_v23  ;;  %1060 = vmatprep.subr.bf16.mxu0 %v1186_v24  ;;  %v352_v23 = vsel %vm296_vm0, %v347_v17, %v351_v18  ;;  %v999_v24 = vcombine.low %v1366_v35, %v1370_v39  ;;  %v353_v37 = vshrl.u32 %v973_v16, 16  ;;  %v1001_v39 = vcombine.low %v1375_v45, %v1378_v50 }
  0x1e   : > { %1112 = vmatprep.subr.bf16.mxu1 %v1187_v25  ;;  %v361_v25 = vshrl.u32 %v974_v62, 16  ;;  %v1006_v55 = vcombine.high %v183_v49, %v183_v49  ;;  %v1005_v60 = vcombine.low %v183_v49, %v183_v49 }
  0x20   : > { %1061 = vmatpush3.bf16.msra.mxu0 %v1188_v26  ;;  %v365_v26 = vshll.u32 %v976_v19, 16  ;;  %v363_v32 = vor.u32 %v361_v25, %v351_v18 }
  0x21   : > { %1113 = vmatpush3.bf16.msra.mxu1 %v1189_v27  ;;  %1062 = vmatprep.subr.bf16.mxu0 %v1190_v28  ;;  %v1002_v27 = vcombine.high %v1375_v45, %v1378_v50  ;;  %v217_v28 = vld [vmem:[%s1354_s27 + $0x58] sm:$0x11]  ;;  %v1003_v50 = vcombine.low %v1381_v51, %v182_v12 }
  0x22   : > { %1114 = vmatprep.subr.bf16.mxu1 %v1191_v29  ;;  %v339_v29 = vor.u32 %v337_v21, %v327_v15  ;;  %v367_v33 = vrot.slane %v365_v26, 1  ;;  %v978_v34 = vcombine.high %v217_v28, %v217_v28  ;;  %v977_v46 = vcombine.low %v217_v28, %v217_v28 }
  0x24   : > { %1063 = vmatpush3.bf16.msra.mxu0 %v1192_v30  ;;  %v343_v30 = vrot.slane %v341_v22, 1  ;;  %v368_v38 = vsel %vm296_vm0, %v363_v32, %v367_v33  ;;  %v381_v41 = vshll.u32 %v978_v34, 16  ;;  %v373_v54 = vshll.u32 %v977_v46, 16 }
  0x25   : > { %1115 = vmatpush3.bf16.msra.mxu1 %v1193_v31  ;;  %v975_v31 = vcombine.low %v182_v12, %v216_v13  ;;  %v387_v59 = vshrl.u32 %v978_v34, 16  ;;  %v385_v61 = vshrl.u32 %v977_v46, 16 }
  0x26   : > { %v344_v36 = vsel %vm296_vm0, %v339_v29, %v343_v30  ;;  %v355_v43 = vor.u32 %v353_v37, %v343_v30  ;;  %v383_v48 = vrot.slane %v381_v41, 1  ;;  %v375_v57 = vrot.slane %v373_v54, 1 }
  0x27   : > { %530 = vmatmul.mubr.bf16.vlgmr.msra.gmra.mrb[0].mxu0 %v308_v7  ;;  %v357_v35 = vshll.u32 %v975_v31, 16  ;;  %v369_v53 = vshrl.u32 %v975_v31, 16 }
  0x28   : > { %736 = vmatmul.mubr.bf16.vlgmr.msra.gmra.mrb[0].mxu1 %v995_v42  ;;  %537 = vmatprep.mubr.bf16.mxu0 %v336_v10  ;;  %v1004_v42 = vcombine.high %v1381_v51, %v182_v12 }
  0x29   : > { %743 = vmatprep.mubr.bf16.mxu1 %v998_v40  ;;  %v377_v40 = vshrl.u32 %v976_v19, 16  ;;  %v359_v44 = vrot.slane %v357_v35, 1 }
  0x2b   : > { %v379_v47 = vor.u32 %v377_v40, %v367_v33  ;;  %v360_v52 = vsel %vm296_vm0, %v355_v43, %v359_v44  ;;  %v371_v56 = vor.u32 %v369_v53, %v359_v44 }
  0x2d   : > { %v384_v45 = vsel %vm296_vm0, %v379_v47, %v383_v48  ;;  %v376_v58 = vsel %vm296_vm0, %v371_v56, %v375_v57 }
  0x2f   : > { %538 = vmatmul.mubr.bf16.gmra.mrb[4].mxu0 %v328_v20 }
  0x30   : > { %744 = vmatmul.mubr.bf16.gmra.mrb[4].mxu1 %v997_v1  ;;  %545 = vmatprep.mubr.bf16.mxu0 %v352_v23 }
  0x31   : > { %751 = vmatprep.mubr.bf16.mxu1 %v1000_v11 }
  0x37   : > { %546 = vmatmul.mubr.bf16.gmra.mrb[8].mxu0 %v344_v36 }
  0x38   : > { %752 = vmatmul.mubr.bf16.gmra.mrb[8].mxu1 %v999_v24  ;;  %553 = vmatprep.mubr.bf16.mxu0 %v368_v38 }
  0x39   : > { %759 = vmatprep.mubr.bf16.mxu1 %v1002_v27 }
  0x3f   : > { %554 = vmatmul.mubr.bf16.gmra.mrb[12].mxu0 %v360_v52 }
  0x40   : > { %760 = vmatmul.mubr.bf16.gmra.mrb[12].mxu1 %v1001_v39  ;;  %561 = vmatprep.mubr.bf16.mxu0 %v384_v45 }
  0x41   : > { %767 = vmatprep.mubr.bf16.mxu1 %v1004_v42 }
  0x47   : > { %562 = vmatmul.mubr.bf16.gmra.mrb[16].mxu0 %v376_v58 }
  0x48   : > { %768 = vmatmul.mubr.bf16.gmra.mrb[16].mxu1 %v1003_v50  ;;  %569 = vmatprep.mubr.bf16.mxu0 %v387_v59 }
  0x49   : > { %775 = vmatprep.mubr.bf16.mxu1 %v1006_v55 }
  0x4f   : > { %570 = vmatmul.mubr.bf16.gmra.mrb[20].mxu0 %v385_v61 }
  0x50   : > { %776 = vmatmul.mubr.bf16.gmra.mrb[20].mxu1 %v1005_v60 }
  0xfa   : > { %v1064_v3 = vpop.f32.mrb[0].mxu0 }
  0xfb   : > { %v1116_v62 = vpop.f32.mrb[0].mxu1  ;;  %v1065_v4 = vpop.f32.mrb[1].mxu0 }
  0xfc   : > { %v1117_v63 = vpop.f32.mrb[1].mxu1  ;;  %v1066_v5 = vadd.f32 %v1065_v4, %v1064_v3  ;;  %v1067_v6 = vpop.f32.mrb[2].mxu0 }
  0xfd   : > { %v1118_v0 = vadd.f32 %v1117_v63, %v1116_v62  ;;  %v1119_v51 = vpop.f32.mrb[2].mxu1  ;;  %v1068_v9 = vpop.f32.mrb[3].mxu0 }
  0xfe   : > { %v1120_v1 = vpop.f32.mrb[3].mxu1  ;;  %v1069_v12 = vadd.f32 %v1068_v9, %v1067_v6 }
  0xff   : > { %v1121_v2 = vadd.f32 %v1120_v1, %v1119_v51  ;;  %v738_v11 = vadd.f32 %v1118_v0, %v1066_v5 }
 0x101   : > { %v789_v16 = vadd.f32 %v1418_v8, %v738_v11  ;;  %v741_v17 = vadd.f32 %v1121_v2, %v1069_v12 }
 0x102   : > { %v1070_v21 = vpop.f32.mrb[4].mxu0 }
 0x103   : > { %v1122_v7 = vpop.f32.mrb[4].mxu1  ;;  %v800_v19 = vmax.f32 %v789_v16, 0.0  ;;  %v790_v20 = vadd.f32 %v1418_v8, %v741_v17  ;;  %v1071_v22 = vpop.f32.mrb[5].mxu0 }
 0x104   : > { %v1123_v10 = vpop.f32.mrb[5].mxu1  ;;  %v1072_v25 = vadd.f32 %v1071_v22, %v1070_v21  ;;  %v1073_v26 = vpop.f32.mrb[6].mxu0 }
 0x105   : > { %v1124_v13 = vadd.f32 %v1123_v10, %v1122_v7  ;;  %v1125_v14 = vpop.f32.mrb[6].mxu1  ;;  %v1037_v23 = vpack.c.bf16 %v800_v19, %v800_v19  ;;  %v801_v24 = vmax.f32 %v790_v20, 0.0  ;;  %v1074_v28 = vpop.f32.mrb[7].mxu0 }
 0x106   : > { %v1126_v15 = vpop.f32.mrb[7].mxu1  ;;  %v1075_v32 = vadd.f32 %v1074_v28, %v1073_v26 }
 0x107   : > { %v1127_v18 = vadd.f32 %v1126_v15, %v1125_v14  ;;  %857 = vst.msk [vmem:[%s1426_s10] sm:$0xf] %vm856_vm1, %v1037_v23  ;;  %v1038_v30 = vpack.c.bf16 %v801_v24, %v801_v24  ;;  %v746_v31 = vadd.f32 %v1124_v13, %v1072_v25 }
 0x109   : > { %858 = vst.msk [vmem:[%s1426_s10 + $0x4] sm:$0xf] %vm856_vm1, %v1038_v30  ;;  %v791_v37 = vadd.f32 %v1418_v8, %v746_v31  ;;  %v749_v35 = vadd.f32 %v1127_v18, %v1075_v32 }
 0x10a   : > { %v1076_v41 = vpop.f32.mrb[8].mxu0 }
 0x10b   : > { %v1128_v27 = vpop.f32.mrb[8].mxu1  ;;  %v802_v39 = vmax.f32 %v791_v37, 0.0  ;;  %v792_v40 = vadd.f32 %v1418_v8, %v749_v35  ;;  %v1077_v42 = vpop.f32.mrb[9].mxu0 }
 0x10c   : > { %v1129_v29 = vpop.f32.mrb[9].mxu1  ;;  %v1078_v46 = vadd.f32 %v1077_v42, %v1076_v41  ;;  %v1079_v47 = vpop.f32.mrb[10].mxu0 }
 0x10d   : > { %v1130_v33 = vadd.f32 %v1129_v29, %v1128_v27  ;;  %v1131_v34 = vpop.f32.mrb[10].mxu1  ;;  %v1039_v43 = vpack.c.bf16 %v802_v39, %v802_v39  ;;  %v803_v44 = vmax.f32 %v792_v40, 0.0  ;;  %v1080_v49 = vpop.f32.mrb[11].mxu0 }
 0x10e   : > { %v1132_v36 = vpop.f32.mrb[11].mxu1  ;;  %v1081_v45 = vadd.f32 %v1080_v49, %v1079_v47  ;;  %v870_v49 = vld [vmem:[%s1426_s10 + $0x28] sm:$0x1] }
 0x10f   : > { %v1133_v38 = vadd.f32 %v1132_v36, %v1131_v34  ;;  %859 = vst.msk [vmem:[%s1426_s10 + $0x8] sm:$0xf] %vm856_vm1, %v1039_v43  ;;  %v1040_v53 = vpack.c.bf16 %v803_v44, %v803_v44  ;;  %v754_v54 = vadd.f32 %v1130_v33, %v1078_v46 }
 0x111   : > { %860 = vst.msk [vmem:[%s1426_s10 + $0xc] sm:$0xf] %vm856_vm1, %v1040_v53  ;;  %v793_v57 = vadd.f32 %v1418_v8, %v754_v54  ;;  %v757_v58 = vadd.f32 %v1133_v38, %v1081_v45 }
 0x112   : > { %v1082_v62 = vpop.f32.mrb[12].mxu0 }
 0x113   : > { %v1134_v48 = vpop.f32.mrb[12].mxu1  ;;  %v804_v60 = vmax.f32 %v793_v57, 0.0  ;;  %v794_v61 = vadd.f32 %v1418_v8, %v757_v58  ;;  %v1083_v63 = vpop.f32.mrb[13].mxu0 }
 0x114   : > { %v1135_v52 = vpop.f32.mrb[13].mxu1  ;;  %v1084_v1 = vadd.f32 %v1083_v63, %v1082_v62  ;;  %v1085_v2 = vpop.f32.mrb[14].mxu0 }
 0x115   : > { %v1136_v50 = vadd.f32 %v1135_v52, %v1134_v48  ;;  %v1137_v55 = vpop.f32.mrb[14].mxu1  ;;  %v1041_v0 = vpack.c.bf16 %v804_v60, %v804_v60  ;;  %v805_v51 = vmax.f32 %v794_v61, 0.0  ;;  %v1086_v4 = vpop.f32.mrb[15].mxu0 }
 0x116   : > { %v1138_v56 = vpop.f32.mrb[15].mxu1  ;;  %v1087_v9 = vadd.f32 %v1086_v4, %v1085_v2 }
 0x117   : > { %v1139_v59 = vadd.f32 %v1138_v56, %v1137_v55  ;;  %861 = vst.msk [vmem:[%s1426_s10 + $0x10] sm:$0xf] %vm856_vm1, %v1041_v0  ;;  %v1042_v6 = vpack.c.bf16 %v805_v51, %v805_v51  ;;  %v762_v7 = vadd.f32 %v1136_v50, %v1084_v1 }
 0x119   : > { %862 = vst.msk [vmem:[%s1426_s10 + $0x14] sm:$0xf] %vm856_vm1, %v1042_v6  ;;  %v795_v13 = vadd.f32 %v1418_v8, %v762_v7  ;;  %v765_v14 = vadd.f32 %v1139_v59, %v1087_v9 }
 0x11a   : > { %v1088_v18 = vpop.f32.mrb[16].mxu0 }
 0x11b   : > { %v1140_v3 = vpop.f32.mrb[16].mxu1  ;;  %v806_v16 = vmax.f32 %v795_v13, 0.0  ;;  %v796_v17 = vadd.f32 %v1418_v8, %v765_v14  ;;  %v1089_v19 = vpop.f32.mrb[17].mxu0 }
 0x11c   : > { %v1141_v5 = vpop.f32.mrb[17].mxu1  ;;  %v1090_v22 = vadd.f32 %v1089_v19, %v1088_v18  ;;  %v1091_v23 = vpop.f32.mrb[18].mxu0 }
 0x11d   : > { %v1142_v10 = vadd.f32 %v1141_v5, %v1140_v3  ;;  %v1143_v11 = vpop.f32.mrb[18].mxu1  ;;  %v1043_v20 = vpack.c.bf16 %v806_v16, %v806_v16  ;;  %v807_v21 = vmax.f32 %v796_v17, 0.0  ;;  %v1092_v25 = vpop.f32.mrb[19].mxu0 }
 0x11e   : > { %v1144_v12 = vpop.f32.mrb[19].mxu1  ;;  %v1093_v29 = vadd.f32 %v1092_v25, %v1091_v23 }
 0x11f   : > { %v1145_v15 = vadd.f32 %v1144_v12, %v1143_v11  ;;  %863 = vst.msk [vmem:[%s1426_s10 + $0x18] sm:$0xf] %vm856_vm1, %v1043_v20  ;;  %v1044_v27 = vpack.c.bf16 %v807_v21, %v807_v21  ;;  %v770_v28 = vadd.f32 %v1142_v10, %v1090_v22 }
 0x121   : > { %864 = vst.msk [vmem:[%s1426_s10 + $0x1c] sm:$0xf] %vm856_vm1, %v1044_v27  ;;  %v797_v33 = vadd.f32 %v1418_v8, %v770_v28  ;;  %v773_v34 = vadd.f32 %v1145_v15, %v1093_v29 }
 0x122   : > { %v1094_v35 = vpop.f32.mrb[20].mxu0 }
 0x123   : > { %v1146_v24 = vpop.f32.mrb[20].mxu1  ;;  %v808_v36 = vmax.f32 %v797_v33, 0.0  ;;  %v798_v37 = vadd.f32 %v1418_v8, %v773_v34  ;;  %v1095_v38 = vpop.f32.mrb[21].mxu0 }
 0x124   : > { %v1147_v26 = vpop.f32.mrb[21].mxu1  ;;  %v1096_v41 = vadd.f32 %v1095_v38, %v1094_v35  ;;  %v1097_v42 = vpop.f32.mrb[22].mxu0 }
 0x125   : > { %v1148_v30 = vadd.f32 %v1147_v26, %v1146_v24  ;;  %v1149_v31 = vpop.f32.mrb[22].mxu1  ;;  %v1045_v39 = vpack.c.bf16 %v808_v36, %v808_v36  ;;  %v809_v40 = vmax.f32 %v798_v37, 0.0  ;;  %v1098_v43 = vpop.f32.mrb[23].mxu0 }
 0x126   : > { %v1150_v32 = vpop.f32.mrb[23].mxu1 }
 0x127   : > { %865 = vst.msk [vmem:[%s1426_s10 + $0x20] sm:$0xf] %vm856_vm1, %v1045_v39  ;;  %v1046_v44 = vpack.c.bf16 %v809_v40, %v809_v40  ;;  %v778_v46 = vadd.f32 %v1148_v30, %v1096_v41 }
 0x129   : > { %866 = vst.msk [vmem:[%s1426_s10 + $0x24] sm:$0xf] %vm856_vm1, %v1046_v44  ;;  %v799_v47 = vadd.f32 %v1418_v8, %v778_v46 }
 0x12b   : > { %v810_v48 = vmax.f32 %v799_v47, 0.0 }
 0x12d   : > { %v1047_v52 = vpack.c.bf16 %v810_v48, %v810_v48 }
 0x12f   : > { %v871_v53 = vsel %vm869_vm4, %v1047_v52, %v870_v49 }
 0x130   : > { %872 = vst [vmem:[%s1426_s10 + $0x28] sm:$0x1] %v871_v53 }
 0x131 PF: > { %s13_s12 = sadd.s32 1, %s1224_s12  }
 0x132   : > { %p10_p4 = scmp.ge.s32.totalorder %s13_s12, 4  }
 0x134   :  { %12 = sbr.rel (!%p10_p4) target bundleno = 1 (0x1), region = 63 }

// kernel: nature_forward.5
= control target key start
LH: loop header
LB: loop body
LE: loop exit
PB: predicated region body
PF: predicated region fallthrough
CT: control target
= control target key end

     0   :  { %s1257_s12 = smov 0   ;;  %s1571_s0 = inlined_call_operand.vmem [shape: bf16[2,63,192], index: 0, kind: input, shape index: {}]   ;;  %s1572_s1 = inlined_call_operand.vmem [shape: bf16[3,192,64], index: 1, kind: input, shape index: {}]   ;;  %s1573_s2 = inlined_call_operand.vmem [shape: f32[1,64], index: 2, kind: input, shape index: {}]   ;;  %s1574_s3 = inlined_call_operand.vmem [shape: bf16[2,49,64], index: 3, kind: output, shape index: {}]  }
   0x1 LB: > { %s996_s13 = sadd.s32 4294967295, %s1234_s12   ;;  %p1000_p0 = scmp.ge.s32.totalorder %s1234_s12, 1  ;;  %s1234_s12 = sphi %s1257_s12, %s13_s12  }
   0x2   : > { %p137_p1 = scmp.lt.s32.totalorder %s1234_s12, 3 }
   0x4   : > { %p138_p2 = pnand %p1000_p0, %p137_p1 }
   0x5   : > { %v1172_v0 = vld [vmem:[%s1572_s1 + $0x60] sm:$0xff] (!%p138_p2)   ;;  %v1236_v1 = vmov (!%p138_p2), 0   ;;  %v1174_v3 = vld [vmem:[%s1572_s1 + $0x68] sm:$0xff] (!%p138_p2)   ;;  %v1176_v5 = vld [vmem:[%s1572_s1 + $0x70] sm:$0xff] (!%p138_p2)   ;;  %p161_p3 = scmp.lt.s32.totalorder (!%p138_p2), %s996_s13, 1  ;;  %vm407_vm0 = vcmask (!%p138_p2), 523264  }
   0x6   : > { %141 = sbr.rel (%p138_p2) target bundleno = 333 (0x14d), region = 32  ;;  %420 = vmatprep.subr.bf16.mxu0 (!%p138_p2), %v1236_v1  ;;  %580 = vmatprep.subr.bf16.mxu1 (!%p138_p2), %v1236_v1  ;;  %v1173_v2 = vld [vmem:[%s1572_s1] sm:$0xff] (!%p138_p2)   ;;  %v1175_v4 = vld [vmem:[%s1572_s1 + $0x8] sm:$0xff] (!%p138_p2)   ;;  %v1177_v6 = vld [vmem:[%s1572_s1 + $0x10] sm:$0xff] (!%p138_p2)   ;;  %vm260_vm1 = vsmask.f32 (!%p138_p2), 4352 }
   0x7   : > { %421 = vmatpush1.bf16.msra.mxu0 (!%p138_p2), %v1172_v0  ;;  %581 = vmatpush1.bf16.msra.mxu1 (!%p138_p2), %v1173_v2  ;;  %v1178_v7 = vld [vmem:[%s1572_s1 + $0x78] sm:$0xff] (!%p138_p2)   ;;  %v1180_v9 = vld [vmem:[%s1572_s1 + $0x80] sm:$0xff] (!%p138_p2)   ;;  %v1182_v11 = vld [vmem:[%s1572_s1 + $0x88] sm:$0xff] (!%p138_p2)   ;;  %vm705_vm2 = vcmask (!%p138_p2), 1044480   ;;  %vm928_vm3 = vcmask (!%p138_p2), 519168   ;;  %vm935_vm4 = vcmask (!%p138_p2), 516096  }
   0x8   : > { %422 = vmatprep.subr.bf16.mxu0 (!%p138_p2), %v1236_v1  ;;  %582 = vmatprep.subr.bf16.mxu1 (!%p138_p2), %v1236_v1  ;;  %v1179_v8 = vld [vmem:[%s1572_s1 + $0x18] sm:$0xff] (!%p138_p2)   ;;  %v1181_v10 = vld [vmem:[%s1572_s1 + $0x20] sm:$0xff] (!%p138_p2)   ;;  %v1183_v12 = vld [vmem:[%s1572_s1 + $0x28] sm:$0xff] (!%p138_p2)   ;;  %vm936_vm5 = vsmask.f32 (!%p138_p2), 256 }
   0x9   : > { %v1184_v13 = vld [vmem:[%s1572_s1 + $0x90] sm:$0xff] (!%p138_p2)   ;;  %v1186_v21 = vld [vmem:[%s1572_s1 + $0x98] sm:$0xff] (!%p138_p2)   ;;  %v1188_v31 = vld [vmem:[%s1572_s1 + $0xa0] sm:$0xff] (!%p138_p2)  }
   0xa   : > { %v1185_v14 = vld [vmem:[%s1572_s1 + $0x30] sm:$0xff] (!%p138_p2)   ;;  %v1187_v24 = vld [vmem:[%s1572_s1 + $0x38] sm:$0xff] (!%p138_p2)   ;;  %v1189_v32 = vld [vmem:[%s1572_s1 + $0x40] sm:$0xff] (!%p138_p2)  }
   0xb   : > { %423 = vmatpush1.bf16.msra.mxu0 (!%p138_p2), %v1174_v3  ;;  %583 = vmatpush1.bf16.msra.mxu1 (!%p138_p2), %v1175_v4  ;;  %v1190_v45 = vld [vmem:[%s1572_s1 + $0xa8] sm:$0xff] (!%p138_p2)   ;;  %v1192_v55 = vld [vmem:[%s1572_s1 + $0xb0] sm:$0xff] (!%p138_p2)   ;;  %v1194_v61 = vld [vmem:[%s1572_s1 + $0xb8] sm:$0xff] (!%p138_p2)  }
   0xc   : > { %424 = vmatprep.subr.bf16.mxu0 (!%p138_p2), %v1236_v1  ;;  %584 = vmatprep.subr.bf16.mxu1 (!%p138_p2), %v1236_v1  ;;  %v1191_v48 = vld [vmem:[%s1572_s1 + $0x48] sm:$0xff] (!%p138_p2)   ;;  %v1193_v58 = vld [vmem:[%s1572_s1 + $0x50] sm:$0xff] (!%p138_p2)   ;;  %vm937_vm6 = vmand (!%p138_p2), %vm935_vm4, %vm936_vm5 }
   0xd   : > { %s1576_s13 = smov (!%p161_p3, %s996_s13), 1 }
   0xe   : > { %s1130_s9 = sshll.u32 %s1576_s13, 6  ;;  %s1162_s18 = smul.u32 28, %s1576_s13 }
   0xf   : > { %425 = vmatpush1.bf16.msra.mxu0 %v1176_v5  ;;  %585 = vmatpush1.bf16.msra.mxu1 %v1177_v6  ;;  %s1323_s16 = scalar_lea.vmem %s1571_s0, %s1130_s9  ;;  %v1195_v5 = vld [vmem:[%s1572_s1 + $0x58] sm:$0xff]  }
  0x10   : > { %426 = vmatprep.subr.bf16.mxu0 %v1236_v1  ;;  %586 = vmatprep.subr.bf16.mxu1 %v1236_v1  ;;  %v1334_v15 = vld [vmem:[%s1323_s16 + $0x8] sm:$0xff]  ;;  %v1337_v16 = vld [vmem:[%s1323_s16 + $0x10] sm:$0xff]  ;;  %v1340_v17 = vld [vmem:[%s1323_s16 + $0x18] sm:$0xff]  ;;  %s1552_s21 = scalar_lea.vmem %s1574_s3, %s1162_s18 }
  0x11   : > { %v204_v18 = vld [vmem:[%s1323_s16] sm:$0x88]  ;;  %v1345_v19 = vcombine.high %v1337_v16, %v1340_v17  ;;  %v1364_v27 = vcombine.low %v1337_v16, %v1340_v17  ;;  %v1385_v44 = vld [vmem:[%s1323_s16 + $0x28] sm:$0xff]  ;;  %v1412_v57 = vld [vmem:[%s1323_s16 + $0x30] sm:$0xff] }
  0x12   : > { %v1348_v20 = vld [vmem:[%s1323_s16] sm:$0xff]  ;;  %v1029_v22 = vcombine.high %v204_v18, %v1334_v15  ;;  %v1028_v30 = vcombine.low %v204_v18, %v1334_v15  ;;  %v1035_v2 = vcombine.high %v1412_v57, %v1412_v57  ;;  %v1433_v6 = vld [vmem:[%s1323_s16 + $0x8] sm:$0x88] }
  0x13   : > { %427 = vmatpush1.bf16.msra.mxu0 %v1178_v7  ;;  %587 = vmatpush1.bf16.msra.mxu1 %v1179_v8  ;;  %v1053_v23 = vcombine.high %v1348_v20, %v1334_v15  ;;  %v287_v25 = vshrl.u32 %v1345_v19, 16  ;;  %v290_v26 = vshll.u32 %v1345_v19, 16  ;;  %v270_v38 = vshrl.u32 %v1364_v27, 16  ;;  %v1382_v43 = vld [vmem:[%s1323_s16 + $0x20] sm:$0xff] }
  0x14   : > { %428 = vmatprep.subr.bf16.mxu0 %v1236_v1  ;;  %588 = vmatprep.subr.bf16.mxu1 %v1236_v1  ;;  %v279_v28 = vshrl.u32 %v1029_v22, 16  ;;  %v282_v29 = vshll.u32 %v1029_v22, 16  ;;  %v273_v39 = vshll.u32 %v1364_v27, 16  ;;  %v262_v41 = vshrl.u32 %v1028_v30, 16 }
  0x15   : > { %1068 = vmatprep.mubr.msk.bf16.mxu1 %vm407_vm0, %v1053_v23  ;;  %v289_v33 = vrot.slane %v287_v25, 3  ;;  %v292_v34 = vrot.slane %v290_v26, 4  ;;  %v265_v42 = vshll.u32 %v1028_v30, 16  ;;  %v1394_v47 = vcombine.high %v1382_v43, %v1385_v44  ;;  %v1203_v26 = vld [vmem:[%s1572_s1 + $0xc8] sm:$0xff]  }
  0x16   : > { %v281_v35 = vrot.slane %v279_v28, 3  ;;  %v284_v36 = vrot.slane %v282_v29, 4  ;;  %v264_v49 = vrot.slane %v262_v41, 3  ;;  %v272_v51 = vrot.slane %v270_v38, 3  ;;  %v1206_v38 = vld [vmem:[%s1572_s1 + $0xe0] sm:$0xff]  }
  0x17   : > { %429 = vmatpush1.bf16.msra.mxu0 %v1180_v9  ;;  %589 = vmatpush1.bf16.msra.mxu1 %v1181_v10  ;;  %v1376_v37 = vor.u32 %v292_v34, %v289_v33  ;;  %v267_v50 = vrot.slane %v265_v42, 4  ;;  %v275_v52 = vrot.slane %v273_v39, 4  ;;  %v305_v53 = vshrl.u32 %v1394_v47, 16 }
  0x18   : > { %430 = vmatprep.subr.bf16.mxu0 %v1236_v1  ;;  %590 = vmatprep.subr.bf16.mxu1 %v1236_v1  ;;  %v285_v40 = vor.u32 %v284_v36, %v281_v35  ;;  %v308_v54 = vshll.u32 %v1394_v47, 16  ;;  %v1409_v56 = vcombine.low %v1382_v43, %v1385_v44  ;;  %v1098_v60 = vcombine.low %v1340_v17, %v1382_v43 }
  0x19   : > { %v276_v59 = vor.u32 %v275_v52, %v272_v51  ;;  %v268_v62 = vor.u32 %v267_v50, %v264_v49  ;;  %v307_v63 = vrot.slane %v305_v53, 3  ;;  %v1052_v7 = vcombine.low %v1348_v20, %v1334_v15  ;;  %v1213_v53 = vld [vmem:[%s1572_s1 + $0xf8] sm:$0xff]  }
  0x1a   : > { %v294_v46 = vsel %vm260_vm1, %v285_v40, %v1376_v37  ;;  %v310_v0 = vrot.slane %v308_v54, 4  ;;  %v296_v3 = vshrl.u32 %v1409_v56, 16  ;;  %v299_v4 = vshll.u32 %v1409_v56, 16  ;;  %v179_v40 = vld [vmem:[%s1323_s16 + $0x30] sm:$0x11] }
  0x1b   : > { %431 = vmatpush1.bf16.msra.mxu0 %v1182_v11  ;;  %591 = vmatpush1.bf16.msra.mxu1 %v1183_v12  ;;  %v1096_v8 = vcombine.low %v1433_v6, %v1337_v16  ;;  %v1440_v9 = vrot.slane %v1098_v60, 3  ;;  %v277_v10 = vsel %vm260_vm1, %v268_v62, %v276_v59  ;;  %v323_v12 = vshrl.u32 %v1035_v2, 16 }
  0x1c   : > { %432 = vmatprep.subr.bf16.mxu0 %v1236_v1  ;;  %592 = vmatprep.subr.bf16.mxu1 %v1236_v1  ;;  %v311_v11 = vor.u32 %v310_v0, %v307_v63  ;;  %v298_v18 = vrot.slane %v296_v3, 3  ;;  %v1034_v15 = vcombine.low %v1412_v57, %v1412_v57  ;;  %v1055_v41 = vcombine.high %v179_v40, %v179_v40 }
  0x1d   : > { %1048 = vmatprep.mubr.msk.bf16.mxu0 %vm407_vm0, %v294_v46  ;;  %v706_v20 = vrot.slane %v1096_v8, 3  ;;  %v1097_v42 = vcombine.high %v1433_v6, %v1337_v16  ;;  %v1209_v46 = vld [vmem:[%s1572_s1 + $0xe8] sm:$0xff]   ;;  %v1054_v49 = vcombine.low %v179_v40, %v179_v40 }
  0x1e   : > { %v312_v23 = vsel %vm260_vm1, %v1376_v37, %v311_v11  ;;  %v314_v29 = vshrl.u32 %v1034_v15, 16  ;;  %v317_v30 = vshll.u32 %v1034_v15, 16 }
  0x1f   : > { %433 = vmatpush1.bf16.msra.mxu0 %v1184_v13  ;;  %593 = vmatpush1.bf16.msra.mxu1 %v1185_v14  ;;  %v326_v13 = vshll.u32 %v1035_v2, 16  ;;  %v1202_v14 = vld [vmem:[%s1572_s1 + $0xc0] sm:$0xff]   ;;  %v1452_v22 = vsel %vm705_vm2, %v706_v20, %v1440_v9  ;;  %v709_v16 = vrot.slane %v1097_v42, 3 }
  0x20   : > { %434 = vmatprep.subr.bf16.mxu0 %v1236_v1  ;;  %594 = vmatprep.subr.bf16.mxu1 %v1236_v1  ;;  %v316_v34 = vrot.slane %v314_v29, 3  ;;  %v319_v35 = vrot.slane %v317_v30, 4  ;;  %v1120_v42 = vld [vmem:[%s1573_s2] ss:$0 sm:$0xff] }
  0x21   : > { %v328_v25 = vrot.slane %v326_v13, 4 }
  0x22   : > { %v320_v37 = vor.u32 %v319_v35, %v316_v34 }
  0x23   : > { %435 = vmatpush1.bf16.msra.mxu0 %v1186_v21  ;;  %595 = vmatpush1.bf16.msra.mxu1 %v1187_v24  ;;  %v301_v21 = vrot.slane %v299_v4, 4  ;;  %v325_v24 = vrot.slane %v323_v12, 3 }
  0x24   : > { %436 = vmatprep.subr.bf16.mxu0 %v1236_v1  ;;  %596 = vmatprep.subr.bf16.mxu1 %v1236_v1 }
  0x25   : > { %v302_v28 = vor.u32 %v301_v21, %v298_v18 }
  0x27   : > { %437 = vmatpush1.bf16.msra.mxu0 %v1188_v31  ;;  %597 = vmatpush1.bf16.msra.mxu1 %v1189_v32  ;;  %v329_v31 = vor.u32 %v328_v25, %v325_v24  ;;  %v1204_v32 = vld [vmem:[%s1572_s1 + $0xd0] sm:$0xff]   ;;  %v303_v33 = vsel %vm260_vm1, %v276_v59, %v302_v28  ;;  %v321_v39 = vsel %vm260_vm1, %v302_v28, %v320_v37 }
  0x28   : > { %438 = vmatprep.subr.bf16.mxu0 %v1236_v1  ;;  %598 = vmatprep.subr.bf16.mxu1 %v1236_v1  ;;  %v1100_v59 = vcombine.low %v1385_v44, %v1412_v57 }
  0x29   : > { %v330_v36 = vsel %vm260_vm1, %v311_v11, %v329_v31 }
  0x2a   : > { %v712_v62 = vrot.slane %v1100_v59, 3 }
  0x2b   : > { %439 = vmatpush1.bf16.msra.mxu0 %v1190_v45  ;;  %599 = vmatpush1.bf16.msra.mxu1 %v1191_v48  ;;  %v1099_v45 = vcombine.high %v1340_v17, %v1382_v43  ;;  %v1210_v43 = vld [vmem:[%s1572_s1 + $0xf0] sm:$0xff]  }
  0x2c   : > { %440 = vmatprep.subr.bf16.mxu0 %v1236_v1  ;;  %600 = vmatprep.subr.bf16.mxu1 %v1236_v1 }
  0x2d   : > { %v710_v17 = vrot.slane %v1099_v45, 3 }
  0x2f   : > { %441 = vmatpush1.bf16.msra.mxu0 %v1192_v55  ;;  %601 = vmatpush1.bf16.msra.mxu1 %v1193_v58  ;;  %v711_v52 = vsel %vm705_vm2, %v709_v16, %v710_v17  ;;  %v1214_v55 = vld [vmem:[%s1572_s1 + $0x100] sm:$0xff]   ;;  %v1218_v58 = vld [vmem:[%s1572_s1 + $0x110] sm:$0xff]  }
  0x30   : > { %442 = vmatprep.subr.bf16.mxu0 %v1236_v1  ;;  %602 = vmatprep.subr.bf16.mxu1 %v1236_v1 }
  0x33   : > { %443 = vmatpush1.bf16.msra.mxu0 %v1194_v61  ;;  %603 = vmatpush1.bf16.msra.mxu1 %v1195_v5  ;;  %v1219_v61 = vld [vmem:[%s1572_s1 + $0x118] sm:$0xff]  }
  0x34   : > { %808 = vmatprep.subr.bf16.mxu0 %v1236_v1  ;;  %1138 = vmatprep.subr.bf16.mxu1 %v1236_v1 }
  0x36   : > { %453 = vmatmul.mubr.bf16.vlgmr.msra.gmra.mrb[0].mxu0 %v277_v10  ;;  %613 = vmatmul.mubr.bf16.vlgmr.msra.gmra.mrb[0].mxu1 %v1052_v7 }
  0x37   : > { %809 = vmatpush1.bf16.msra.mxu0 %v1202_v14  ;;  %1150 = vmatpush1.bf16.msra.mxu1 %v1202_v14 }
  0x38   : > { %810 = vmatprep.subr.bf16.mxu0 %v1236_v1  ;;  %1139 = vmatprep.subr.bf16.mxu1 %v1236_v1 }
  0x39   : > { %1049 = vmatprep.mubr.msk.bf16.mxu0 %vm407_vm0, %v312_v23  ;;  %1069 = vmatprep.mubr.msk.bf16.mxu1 %vm407_vm0, %v1345_v19  ;;  %v1205_v19 = vld [vmem:[%s1572_s1 + $0xd8] sm:$0xff]  }
  0x3b   : > { %811 = vmatpush1.bf16.msra.mxu0 %v1203_v26  ;;  %1151 = vmatpush1.bf16.msra.mxu1 %v1203_v26 }
  0x3c   : > { %812 = vmatprep.subr.bf16.mxu0 %v1236_v1  ;;  %1140 = vmatprep.subr.bf16.mxu1 %v1236_v1 }
  0x3e   : > { %461 = vmatmul.mubr.bf16.gmra.mrb[4].mxu0 %v303_v33  ;;  %621 = vmatmul.mubr.bf16.gmra.mrb[4].mxu1 %v1364_v27  ;;  %v650_v27 = vld [vmem:[%s1323_s16 + $0x38] sm:$0xff] }
  0x3f   : > { %813 = vmatpush1.bf16.msra.mxu0 %v1204_v32  ;;  %1152 = vmatpush1.bf16.msra.mxu1 %v1204_v32  ;;  %v1103_v48 = vcombine.high %v650_v27, %v650_v27  ;;  %v1102_v60 = vcombine.low %v650_v27, %v650_v27 }
  0x40   : > { %814 = vmatprep.subr.bf16.mxu0 %v1236_v1  ;;  %1141 = vmatprep.subr.bf16.mxu1 %v1236_v1 }
  0x41   : > { %1050 = vmatprep.mubr.msk.bf16.mxu0 %vm407_vm0, %v330_v36  ;;  %1070 = vmatprep.mubr.msk.bf16.mxu1 %vm407_vm0, %v1394_v47  ;;  %v1101_v47 = vcombine.high %v1385_v44, %v1412_v57  ;;  %v718_v51 = vrot.slane %v1103_v48, 3  ;;  %v716_v63 = vrot.slane %v1102_v60, 3  ;;  %v713_v57 = vsel %vm705_vm2, %v1440_v9, %v712_v62 }
  0x43   : > { %815 = vmatpush1.bf16.msra.mxu0 %v1205_v19  ;;  %1153 = vmatpush1.bf16.msra.mxu1 %v1205_v19  ;;  %v714_v50 = vrot.slane %v1101_v47, 3  ;;  %v717_v0 = vsel %vm705_vm2, %v712_v62, %v716_v63 }
  0x44   : > { %816 = vmatprep.subr.bf16.mxu0 %v1236_v1  ;;  %1142 = vmatprep.subr.bf16.mxu1 %v1236_v1 }
  0x45   : > { %v719_v54 = vsel %vm705_vm2, %v714_v50, %v718_v51  ;;  %v715_v44 = vsel %vm705_vm2, %v710_v17, %v714_v50 }
  0x46   : > { %469 = vmatmul.mubr.bf16.gmra.mrb[8].mxu0 %v321_v39  ;;  %629 = vmatmul.mubr.bf16.gmra.mrb[8].mxu1 %v1409_v56  ;;  %v1216_v56 = vld [vmem:[%s1572_s1 + $0x108] sm:$0xff]  }
  0x47   : > { %817 = vmatpush1.bf16.msra.mxu0 %v1206_v38  ;;  %1154 = vmatpush1.bf16.msra.mxu1 %v1206_v38 }
  0x48   : > { %818 = vmatprep.subr.bf16.mxu0 %v1236_v1  ;;  %1143 = vmatprep.subr.bf16.mxu1 %v1236_v1 }
  0x49   : > { %1051 = vmatprep.mubr.msk.bf16.mxu0 %vm407_vm0, %v325_v24  ;;  %1071 = vmatprep.mubr.msk.bf16.mxu1 %vm407_vm0, %v1055_v41 }
  0x4b   : > { %819 = vmatpush1.bf16.msra.mxu0 %v1209_v46  ;;  %1155 = vmatpush1.bf16.msra.mxu1 %v1209_v46 }
  0x4c   : > { %820 = vmatprep.subr.bf16.mxu0 %v1236_v1  ;;  %1144 = vmatprep.subr.bf16.mxu1 %v1236_v1 }
  0x4e   : > { %477 = vmatmul.mubr.bf16.gmra.mrb[12].mxu0 %v316_v34  ;;  %637 = vmatmul.mubr.bf16.gmra.mrb[12].mxu1 %v1054_v49 }
  0x4f   : > { %821 = vmatpush1.bf16.msra.mxu0 %v1210_v43  ;;  %1156 = vmatpush1.bf16.msra.mxu1 %v1210_v43 }
  0x50   : > { %822 = vmatprep.subr.bf16.mxu0 %v1236_v1  ;;  %1145 = vmatprep.subr.bf16.mxu1 %v1236_v1 }
  0x51   : > { %1116 = vmatprep.mubr.msk.bf16.mxu0 %vm407_vm0, %v711_v52  ;;  %1118 = vmatprep.mubr.msk.bf16.mxu1 %vm407_vm0, %v719_v54 }
  0x53   : > { %823 = vmatpush1.bf16.msra.mxu0 %v1213_v53  ;;  %1157 = vmatpush1.bf16.msra.mxu1 %v1213_v53 }
  0x54   : > { %824 = vmatprep.subr.bf16.mxu0 %v1236_v1  ;;  %1146 = vmatprep.subr.bf16.mxu1 %v1236_v1 }
  0x57   : > { %825 = vmatpush1.bf16.msra.mxu0 %v1214_v55  ;;  %1158 = vmatpush1.bf16.msra.mxu1 %v1214_v55 }
  0x58   : > { %826 = vmatprep.subr.bf16.mxu0 %v1236_v1  ;;  %1147 = vmatprep.subr.bf16.mxu1 %v1236_v1 }
  0x5b   : > { %827 = vmatpush1.bf16.msra.mxu0 %v1216_v56  ;;  %1159 = vmatpush1.bf16.msra.mxu1 %v1216_v56 }
  0x5c   : > { %828 = vmatprep.subr.bf16.mxu0 %v1236_v1  ;;  %1148 = vmatprep.subr.bf16.mxu1 %v1236_v1 }
  0x5f   : > { %829 = vmatpush1.bf16.msra.mxu0 %v1218_v58  ;;  %1160 = vmatpush1.bf16.msra.mxu1 %v1218_v58 }
  0x60   : > { %830 = vmatprep.subr.bf16.mxu0 %v1236_v1  ;;  %1149 = vmatprep.subr.bf16.mxu1 %v1236_v1 }
  0x63   : > { %831 = vmatpush1.bf16.msra.mxu0 %v1219_v61  ;;  %1161 = vmatpush1.bf16.msra.mxu1 %v1219_v61 }
  0x66   : > { %841 = vmatmul.mubr.bf16.vlgmr.msra.gmra.mrb[16].mxu0 %v1452_v22  ;;  %857 = vmatmul.mubr.bf16.vlgmr.msra.gmra.mrb[16].mxu1 %v717_v0 }
  0x67   : > { %1117 = vmatprep.mubr.msk.bf16.mxu0 %vm407_vm0, %v715_v44  ;;  %1119 = vmatprep.mubr.msk.bf16.mxu1 %vm407_vm0, %v718_v51 }
  0x6e   : > { %849 = vmatmul.mubr.bf16.gmra.mrb[20].mxu0 %v713_v57  ;;  %865 = vmatmul.mubr.bf16.gmra.mrb[20].mxu1 %v716_v63 }
 0x109   : > { %v454_v2 = vpop.f32.mrb[0].mxu0  ;;  %v614_v1 = vpop.f32.mrb[0].mxu1 }
 0x10a   : > { %v456_v3 = vpop.f32.mrb[1].mxu0  ;;  %v615_v4 = vadd.f32 %v614_v1, %v454_v2  ;;  %v616_v5 = vpop.f32.mrb[1].mxu1 }
 0x10b   : > { %v457_v6 = vpop.f32.mrb[2].mxu0  ;;  %v617_v7 = vpop.f32.mrb[2].mxu1 }
 0x10c   : > { %v459_v8 = vpop.f32.mrb[3].mxu0  ;;  %v618_v10 = vadd.f32 %v617_v7, %v457_v6  ;;  %v619_v11 = vpop.f32.mrb[3].mxu1 }
 0x111   : > { %v462_v12 = vpop.f32.mrb[4].mxu0  ;;  %v622_v14 = vpop.f32.mrb[4].mxu1 }
 0x112   : > { %v464_v13 = vpop.f32.mrb[5].mxu0  ;;  %v623_v18 = vadd.f32 %v622_v14, %v462_v12  ;;  %v624_v15 = vpop.f32.mrb[5].mxu1 }
 0x113   : > { %v465_v21 = vpop.f32.mrb[6].mxu0  ;;  %v625_v9 = vpop.f32.mrb[6].mxu1 }
 0x114   : > { %v467_v20 = vpop.f32.mrb[7].mxu0  ;;  %v626_v22 = vadd.f32 %v625_v9, %v465_v21  ;;  %v627_v23 = vpop.f32.mrb[7].mxu1  ;;  %v938_v9 = vld [vmem:[%s1552_s21 + $0x18] sm:$0x1] }
 0x119   : > { %v470_v24 = vpop.f32.mrb[8].mxu0  ;;  %v630_v26 = vpop.f32.mrb[8].mxu1 }
 0x11a   : > { %v472_v25 = vpop.f32.mrb[9].mxu0  ;;  %v631_v28 = vadd.f32 %v630_v26, %v470_v24  ;;  %v632_v30 = vpop.f32.mrb[9].mxu1 }
 0x11b   : > { %v473_v29 = vpop.f32.mrb[10].mxu0  ;;  %v633_v32 = vpop.f32.mrb[10].mxu1 }
 0x11c   : > { %v475_v31 = vpop.f32.mrb[11].mxu0  ;;  %v634_v33 = vadd.f32 %v633_v32, %v473_v29  ;;  %v635_v34 = vpop.f32.mrb[11].mxu1 }
 0x121   : > { %v478_v35 = vpop.f32.mrb[12].mxu0  ;;  %v638_v19 = vpop.f32.mrb[12].mxu1 }
 0x122   : > { %v480_v36 = vpop.f32.mrb[13].mxu0  ;;  %v639_v37 = vadd.f32 %v638_v19, %v478_v35  ;;  %v640_v39 = vpop.f32.mrb[13].mxu1 }
 0x123   : > { %v481_v38 = vpop.f32.mrb[14].mxu0  ;;  %v641_v27 = vpop.f32.mrb[14].mxu1 }
 0x124   : > { %v482_v40 = vpop.f32.mrb[15].mxu0  ;;  %v642_v41 = vpop.f32.mrb[15].mxu1 }
 0x139   : > { %v842_v45 = vpop.f32.mrb[16].mxu0  ;;  %v858_v47 = vpop.f32.mrb[16].mxu1 }
 0x13a   : > { %v872_v46 = vadd.f32 %v842_v45, %v615_v4  ;;  %v844_v48 = vpop.f32.mrb[17].mxu0  ;;  %v876_v16 = vadd.f32 %v858_v47, %v631_v28  ;;  %v860_v17 = vpop.f32.mrb[17].mxu1 }
 0x13b   : > { %v845_v43 = vpop.f32.mrb[18].mxu0  ;;  %v861_v51 = vpop.f32.mrb[18].mxu1 }
 0x13c   : > { %v885_v49 = vadd.f32 %v1120_v42, %v872_v46  ;;  %v873_v50 = vadd.f32 %v845_v43, %v618_v10  ;;  %v847_v52 = vpop.f32.mrb[19].mxu0  ;;  %v889_v53 = vadd.f32 %v1120_v42, %v876_v16  ;;  %v877_v54 = vadd.f32 %v861_v51, %v634_v33  ;;  %v863_v55 = vpop.f32.mrb[19].mxu1 }
 0x13e   : > { %v892_v56 = vmax.f32 %v885_v49, 0.0  ;;  %v886_v58 = vadd.f32 %v1120_v42, %v873_v50  ;;  %v896_v59 = vmax.f32 %v889_v53, 0.0  ;;  %v890_v60 = vadd.f32 %v1120_v42, %v877_v54 }
 0x140   : > { %v1131_v61 = vpack.c.bf16 %v892_v56, %v892_v56  ;;  %v893_v62 = vmax.f32 %v886_v58, 0.0  ;;  %v1135_v63 = vpack.c.bf16 %v896_v59, %v896_v59  ;;  %v897_v0 = vmax.f32 %v890_v60, 0.0 }
 0x141   : > { %v850_v44 = vpop.f32.mrb[20].mxu0  ;;  %v866_v1 = vpop.f32.mrb[20].mxu1 }
 0x142   : > { %929 = vst.msk [vmem:[%s1552_s21] sm:$0xf] %vm928_vm3, %v1131_v61  ;;  %v1132_v57 = vpack.c.bf16 %v893_v62, %v893_v62  ;;  %v874_v2 = vadd.f32 %v850_v44, %v623_v18  ;;  %v852_v3 = vpop.f32.mrb[21].mxu0  ;;  %933 = vst.msk [vmem:[%s1552_s21 + $0x10] sm:$0xf] %vm928_vm3, %v1135_v63  ;;  %v1136_v4 = vpack.c.bf16 %v897_v0, %v897_v0  ;;  %v868_v6 = vpop.f32.mrb[21].mxu1 }
 0x143   : > { %v878_v5 = vadd.f32 %v866_v1, %v639_v37  ;;  %v853_v7 = vpop.f32.mrb[22].mxu0  ;;  %v869_v11 = vpop.f32.mrb[22].mxu1 }
 0x144   : > { %930 = vst.msk [vmem:[%s1552_s21 + $0x4] sm:$0xf] %vm928_vm3, %v1132_v57  ;;  %v887_v8 = vadd.f32 %v1120_v42, %v874_v2  ;;  %v875_v10 = vadd.f32 %v853_v7, %v626_v22  ;;  %v855_v12 = vpop.f32.mrb[23].mxu0  ;;  %934 = vst.msk [vmem:[%s1552_s21 + $0x14] sm:$0xf] %vm928_vm3, %v1136_v4  ;;  %v870_v14 = vpop.f32.mrb[23].mxu1 }
 0x145   : > { %v891_v13 = vadd.f32 %v1120_v42, %v878_v5 }
 0x146   : > { %v894_v18 = vmax.f32 %v887_v8, 0.0  ;;  %v888_v21 = vadd.f32 %v1120_v42, %v875_v10 }
 0x147   : > { %v898_v15 = vmax.f32 %v891_v13, 0.0 }
 0x148   : > { %v1133_v20 = vpack.c.bf16 %v894_v18, %v894_v18  ;;  %v895_v23 = vmax.f32 %v888_v21, 0.0 }
 0x149   : > { %v1137_v24 = vpack.c.bf16 %v898_v15, %v898_v15 }
 0x14a   : > { %931 = vst.msk [vmem:[%s1552_s21 + $0x8] sm:$0xf] %vm928_vm3, %v1133_v20  ;;  %v1134_v22 = vpack.c.bf16 %v895_v23, %v895_v23 }
 0x14b   : > { %v939_v25 = vsel %vm937_vm6, %v1137_v24, %v938_v9 }
 0x14c   : > { %940 = vst [vmem:[%s1552_s21 + $0x18] sm:$0x1] %v939_v25  ;;  %932 = vst.msk [vmem:[%s1552_s21 + $0xc] sm:$0xf] %vm928_vm3, %v1134_v22 }
 0x14d PF: > { %s13_s12 = sadd.s32 1, %s1234_s12  }
 0x14e   : > { %p10_p4 = scmp.ge.s32.totalorder %s13_s12, 4  }
 0x150   :  { %12 = sbr.rel (!%p10_p4) target bundleno = 1 (0x1), region = 64 }

</bundles_post_ra>
